<compile_context>
chip_gen: v7x
topology: tpu7x:2x2x1
jax: 0.10.0
libtpu: 0.0.40
codegen_flags: <defaults>
</compile_context>

<pallas_src>
import functools

import jax
import jax.numpy as jnp
from jax.experimental import pallas as pl
from jax.experimental.pallas import tpu as pltpu


def _softplus(z):
    # matches torch.nn.functional.softplus (threshold=20).  log(1+exp(z)) is
    # kept (rather than log1p) to stay on ops with guaranteed Mosaic
    # lowerings; the f32 precision difference is negligible for the forward.
    return jnp.where(z > 20.0, z, jnp.log(1.0 + jnp.exp(jnp.minimum(z, 20.0))))


def _sigmoid(z):
    # exp + approx reciprocal both go to the EUP (own VLIW slot).
    return pl.reciprocal(1.0 + jnp.exp(-z), approx=True)


def _softmax_last(z):
    m = jnp.max(z, axis=-1, keepdims=True)
    e = jnp.exp(z - m)
    return e * pl.reciprocal(jnp.sum(e, axis=-1, keepdims=True), approx=True)


def write_head_kernel(x_ref, prev_ref, mem_ref, wf_ref, bf_ref,
                      w_out_ref, mem_out_ref):
    x = x_ref[...]                       # (B, H)
    prev = prev_ref[...]                 # (B, N)
    mem = mem_ref[...]                   # (B, N, M)
    B, N, M = mem.shape

    # --- single fused projection: one MXU pass instead of 7 ----------------
    # fused column layout (built in the wrapper):
    #   [k : 0..M) [e : M..2M) [a : 2M..3M) [beta] [g] [s0 s1 s2] [gamma] pad
    y = jnp.dot(x, wf_ref[...], preferred_element_type=jnp.float32) + bf_ref[...]
    k = y[:, 0:M]                                    # (B, M)
    e = _sigmoid(y[:, M:2 * M])                      # (B, M)
    a = y[:, 2 * M:3 * M]                            # (B, M)
    o = 3 * M
    beta = _softplus(y[:, o:o + 1])                  # (B, 1)
    g = _sigmoid(y[:, o + 1:o + 2])                  # (B, 1)
    s = _softmax_last(y[:, o + 2:o + 5])             # (B, 3)
    gamma = 1.0 + _softplus(y[:, o + 5:o + 6])       # (B, 1)

    # --- content addressing: cosine similarity of memory rows vs. key ------
    m_eps = mem + 1e-16
    k_eps = k[:, None, :] + 1e-16                    # (B, 1, M)
    dot = jnp.sum(m_eps * k_eps, axis=-1)            # (B, N)
    nm = jnp.sum(m_eps * m_eps, axis=-1)             # (B, N)
    nk = jnp.sum(k_eps * k_eps, axis=-1)             # (B, 1)
    cos = dot * jax.lax.rsqrt(jnp.maximum(nm * nk, 1e-8 * 1e-8))

    w_c = _softmax_last(beta * cos)                  # (B, N)
    w_g = g * w_c + (1.0 - g) * prev                 # (B, N)

    # --- circular 3-tap shift via XLU lane rotations ------------------------
    # shifted[i] = s0 * w_g[(i-1)%N] + s1 * w_g[i] + s2 * w_g[(i+1)%N]
    w_prev = pltpu.roll(w_g, shift=1, axis=1)        # w_g[(i-1) % N]
    w_next = pltpu.roll(w_g, shift=N - 1, axis=1)    # w_g[(i+1) % N]
    w_t = s[:, 0:1] * w_prev + s[:, 1:2] * w_g + s[:, 2:3] * w_next

    # --- sharpening + renormalisation ---------------------------------------
    w_pow = jnp.exp(gamma * jnp.log(jnp.maximum(w_t, 1e-16)))   # w_t ** gamma
    w = w_pow * pl.reciprocal(jnp.sum(w_pow, axis=-1, keepdims=True) + 1e-16,
                              approx=True)

    # --- write-head specific outputs + memory update ------------------------
    erase = w[:, :, None] * e[:, None, :]            # (B, N, M)
    add = w[:, :, None] * a[:, None, :]              # (B, N, M)

    w_out_ref[...] = w
    mem_out_ref[...] = mem * (1.0 - erase) + add


def fuse_head_params(params):
    """Concatenate the 7 Linear layers into one lane-padded weight/bias pair."""
    order = ("k", "e", "a", "beta", "g", "s", "gamma")
    w = jnp.concatenate([params["w" + n] for n in order], axis=1)
    b = jnp.concatenate([params["b" + n] for n in order], axis=1)
    pad = (-w.shape[1]) % 128              # pad fused output dim to 128 lanes
    w = jnp.pad(w, ((0, 0), (0, pad)))
    b = jnp.pad(b, ((0, 0), (0, pad)))
    return w, b


@functools.partial(jax.jit, donate_argnums=(2,))
def write_head_forward(x, previous_state, memory, w_fused, b_fused):
    """Returns (w, new_memory) — forward() returns w; the memory.write() side
    effect is surfaced as the second output, aliased onto the memory input."""
    B, _ = x.shape
    _, N, M = memory.shape
    vmem = pl.BlockSpec(memory_space=pltpu.MemorySpace.VMEM)
    # TODO(synk): at production-size (B, N, M), add a batch grid axis with
    # "parallel" dimension_semantics (v7x second TensorCore) and size the
    # memory tile against the per-generation scoped-VMEM limit.
    return pl.pallas_call(
        write_head_kernel,
        out_shape=(jax.ShapeDtypeStruct((B, N), jnp.float32),
                   jax.ShapeDtypeStruct((B, N, M), jnp.float32)),
        in_specs=[vmem] * 5,
        out_specs=(vmem, vmem),
        input_output_aliases={2: 1},       # new_memory reuses the memory buffer
    )(x, previous_state, memory, w_fused, b_fused)


def _xavier_uniform(key, fan_in, fan_out, gain=1.4):
    bound = gain * (6.0 / (fan_in + fan_out)) ** 0.5
    return jax.random.uniform(key, (fan_in, fan_out), jnp.float32, -bound, bound)


def make_params(key, hidden_size, memory_vector_length):
    # layers: k, beta, g, s, gamma (Head) + e, a (WriteHead)
    layer_out = {"k": memory_vector_length, "beta": 1, "g": 1, "s": 3,
                 "gamma": 1, "e": memory_vector_length, "a": memory_vector_length}
    params = {}
    for name, out_dim in layer_out.items():
        key, kw, kb = jax.random.split(key, 3)
        params["w" + name] = _xavier_uniform(kw, hidden_size, out_dim)
        params["b" + name] = 0.01 * jax.random.normal(kb, (1, out_dim), jnp.float32)
    return params


if __name__ == "__main__":
    B, H = 2, 32          # batch, hidden_size
    N, M = 128, 128       # memory_length, memory_vector_length (lane-dense)

    key = jax.random.PRNGKey(0)
    kx, kprev, kmem, kparams = jax.random.split(key, 4)

    x = jax.random.normal(kx, (B, H), jnp.float32)
    previous_state = jax.nn.softmax(
        jax.random.normal(kprev, (B, N), jnp.float32), axis=1)
    memory = 0.1 * jax.random.normal(kmem, (B, N, M), jnp.float32)  # memory.read()
    params = make_params(kparams, H, M)
    w_fused, b_fused = fuse_head_params(params)

    w, new_memory = write_head_forward(x, previous_state, memory, w_fused, b_fused)
    jax.block_until_ready((w, new_memory))

    assert w.shape == (B, N) and new_memory.shape == (B, N, M)
    assert bool(jnp.all(jnp.isfinite(w))) and bool(jnp.all(jnp.isfinite(new_memory)))
    # head weights form a (sharpened, renormalised) distribution over N rows
    assert bool(jnp.all(jnp.abs(jnp.sum(w, axis=1) - 1.0) < 5e-2))
    print("KERNEL_OK")
</pallas_src>

<mosaic_0001>
module attributes {stable_mosaic.version = 11 : i64} {
  func.func @write_head_kernel(%arg0: memref<2x32xf32, #tpu.memory_space<vmem>>, %arg1: memref<2x128xf32, #tpu.memory_space<vmem>>, %arg2: memref<2x128x128xf32, #tpu.memory_space<vmem>>, %arg3: memref<32x512xf32, #tpu.memory_space<vmem>>, %arg4: memref<1x512xf32, #tpu.memory_space<vmem>>, %arg5: memref<2x128xf32, #tpu.memory_space<vmem>>, %arg6: memref<2x128x128xf32, #tpu.memory_space<vmem>>) attributes {dimension_semantics = [], scalar_prefetch = 0 : i64, scratch_operands = 0 : i64, tpu.core_type = #tpu.core_type<tc>} {
    %c0 = arith.constant 0 : index
    %c0_0 = arith.constant 0 : index
    %0 = vector.load %arg0[%c0, %c0_0] : memref<2x32xf32, #tpu.memory_space<vmem>>, vector<2x32xf32>
    %c0_1 = arith.constant 0 : index
    %c0_2 = arith.constant 0 : index
    %1 = vector.load %arg1[%c0_1, %c0_2] : memref<2x128xf32, #tpu.memory_space<vmem>>, vector<2x128xf32>
    %c0_3 = arith.constant 0 : index
    %c0_4 = arith.constant 0 : index
    %c0_5 = arith.constant 0 : index
    %2 = vector.load %arg2[%c0_3, %c0_4, %c0_5] : memref<2x128x128xf32, #tpu.memory_space<vmem>>, vector<2x128x128xf32>
    %c0_6 = arith.constant 0 : index
    %c0_7 = arith.constant 0 : index
    %3 = vector.load %arg3[%c0_6, %c0_7] : memref<32x512xf32, #tpu.memory_space<vmem>>, vector<32x512xf32>
    %cst = arith.constant dense<0.000000e+00> : vector<2x512xf32>
    %4 = tpu.matmul %0, %3, %cst {dimension_numbers = #tpu.dot_dimension_numbers<[1], [0], [0], [1], [0, 0, 1, 1], [], []>} : vector<2x32xf32>, vector<32x512xf32>, vector<2x512xf32> -> vector<2x512xf32>
    %c0_8 = arith.constant 0 : index
    %c0_9 = arith.constant 0 : index
    %5 = vector.load %arg4[%c0_8, %c0_9] : memref<1x512xf32, #tpu.memory_space<vmem>>, vector<1x512xf32>
    %6 = vector.broadcast %5 : vector<1x512xf32> to vector<2x512xf32>
    %7 = arith.addf %4, %6 : vector<2x512xf32>
    %8 = vector.extract_strided_slice %7 {offsets = [0, 0], sizes = [2, 128], strides = [1, 1]} : vector<2x512xf32> to vector<2x128xf32>
    %9 = vector.extract_strided_slice %7 {offsets = [0, 128], sizes = [2, 128], strides = [1, 1]} : vector<2x512xf32> to vector<2x128xf32>
    %cst_10 = arith.constant 0.000000e+00 : f32
    %10 = vector.broadcast %cst_10 : f32 to vector<2x128xf32>
    %11 = arith.subf %10, %9 : vector<2x128xf32>
    %12 = math.exp %11 : vector<2x128xf32>
    %cst_11 = arith.constant 1.000000e+00 : f32
    %13 = vector.broadcast %cst_11 : f32 to vector<2x128xf32>
    %14 = arith.addf %13, %12 : vector<2x128xf32>
    %15 = tpu.reciprocal %14 {approx = true} : vector<2x128xf32> -> vector<2x128xf32>
    %16 = vector.extract_strided_slice %7 {offsets = [0, 256], sizes = [2, 128], strides = [1, 1]} : vector<2x512xf32> to vector<2x128xf32>
    %17 = vector.extract_strided_slice %7 {offsets = [0, 384], sizes = [2, 1], strides = [1, 1]} : vector<2x512xf32> to vector<2x1xf32>
    %cst_12 = arith.constant 2.000000e+01 : f32
    %18 = vector.broadcast %cst_12 : f32 to vector<2x1xf32>
    %19 = arith.cmpf ogt, %17, %18 : vector<2x1xf32>
    %cst_13 = arith.constant 2.000000e+01 : f32
    %20 = vector.broadcast %cst_13 : f32 to vector<2x1xf32>
    %21 = arith.minimumf %17, %20 : vector<2x1xf32>
    %22 = math.exp %21 : vector<2x1xf32>
    %cst_14 = arith.constant 1.000000e+00 : f32
    %23 = vector.broadcast %cst_14 : f32 to vector<2x1xf32>
    %24 = arith.addf %23, %22 : vector<2x1xf32>
    %25 = math.log %24 : vector<2x1xf32>
    %26 = arith.select %19, %17, %25 : vector<2x1xi1>, vector<2x1xf32>
    %27 = vector.extract_strided_slice %7 {offsets = [0, 385], sizes = [2, 1], strides = [1, 1]} : vector<2x512xf32> to vector<2x1xf32>
    %cst_15 = arith.constant 0.000000e+00 : f32
    %28 = vector.broadcast %cst_15 : f32 to vector<2x1xf32>
    %29 = arith.subf %28, %27 : vector<2x1xf32>
    %30 = math.exp %29 : vector<2x1xf32>
    %cst_16 = arith.constant 1.000000e+00 : f32
    %31 = vector.broadcast %cst_16 : f32 to vector<2x1xf32>
    %32 = arith.addf %31, %30 : vector<2x1xf32>
    %33 = tpu.reciprocal %32 {approx = true} : vector<2x1xf32> -> vector<2x1xf32>
    %34 = vector.extract_strided_slice %7 {offsets = [0, 386], sizes = [2, 3], strides = [1, 1]} : vector<2x512xf32> to vector<2x3xf32>
    %cst_17 = arith.constant dense<0xFF800000> : vector<2xf32>
    %35 = vector.multi_reduction <maximumf>, %34, %cst_17 [1] : vector<2x3xf32> to vector<2xf32>
    %36 = vector.shape_cast %35 : vector<2xf32> to vector<2x1xf32>
    %37 = vector.broadcast %36 : vector<2x1xf32> to vector<2x3xf32>
    %38 = arith.subf %34, %37 : vector<2x3xf32>
    %39 = math.exp %38 : vector<2x3xf32>
    %cst_18 = arith.constant dense<0.000000e+00> : vector<2xf32>
    %40 = vector.multi_reduction <add>, %39, %cst_18 [1] : vector<2x3xf32> to vector<2xf32>
    %41 = vector.shape_cast %40 : vector<2xf32> to vector<2x1xf32>
    %42 = tpu.reciprocal %41 {approx = true} : vector<2x1xf32> -> vector<2x1xf32>
    %43 = vector.broadcast %42 : vector<2x1xf32> to vector<2x3xf32>
    %44 = arith.mulf %39, %43 : vector<2x3xf32>
    %45 = vector.extract_strided_slice %7 {offsets = [0, 389], sizes = [2, 1], strides = [1, 1]} : vector<2x512xf32> to vector<2x1xf32>
    %cst_19 = arith.constant 2.000000e+01 : f32
    %46 = vector.broadcast %cst_19 : f32 to vector<2x1xf32>
    %47 = arith.cmpf ogt, %45, %46 : vector<2x1xf32>
    %cst_20 = arith.constant 2.000000e+01 : f32
    %48 = vector.broadcast %cst_20 : f32 to vector<2x1xf32>
    %49 = arith.minimumf %45, %48 : vector<2x1xf32>
    %50 = math.exp %49 : vector<2x1xf32>
    %cst_21 = arith.constant 1.000000e+00 : f32
    %51 = vector.broadcast %cst_21 : f32 to vector<2x1xf32>
    %52 = arith.addf %51, %50 : vector<2x1xf32>
    %53 = math.log %52 : vector<2x1xf32>
    %54 = arith.select %47, %45, %53 : vector<2x1xi1>, vector<2x1xf32>
    %cst_22 = arith.constant 1.000000e+00 : f32
    %55 = vector.broadcast %cst_22 : f32 to vector<2x1xf32>
    %56 = arith.addf %55, %54 : vector<2x1xf32>
    %cst_23 = arith.constant 1.000000e-16 : f32
    %57 = vector.broadcast %cst_23 : f32 to vector<2x128x128xf32>
    %58 = arith.addf %2, %57 : vector<2x128x128xf32>
    %59 = vector.shape_cast %8 : vector<2x128xf32> to vector<2x1x128xf32>
    %cst_24 = arith.constant 1.000000e-16 : f32
    %60 = vector.broadcast %cst_24 : f32 to vector<2x1x128xf32>
    %61 = arith.addf %59, %60 : vector<2x1x128xf32>
    %62 = vector.broadcast %61 : vector<2x1x128xf32> to vector<2x128x128xf32>
    %63 = arith.mulf %58, %62 : vector<2x128x128xf32>
    %cst_25 = arith.constant dense<0.000000e+00> : vector<2x128xf32>
    %64 = vector.multi_reduction <add>, %63, %cst_25 [2] : vector<2x128x128xf32> to vector<2x128xf32>
    %65 = arith.mulf %58, %58 : vector<2x128x128xf32>
    %cst_26 = arith.constant dense<0.000000e+00> : vector<2x128xf32>
    %66 = vector.multi_reduction <add>, %65, %cst_26 [2] : vector<2x128x128xf32> to vector<2x128xf32>
    %67 = arith.mulf %61, %61 : vector<2x1x128xf32>
    %cst_27 = arith.constant dense<0.000000e+00> : vector<2x1xf32>
    %68 = vector.multi_reduction <add>, %67, %cst_27 [2] : vector<2x1x128xf32> to vector<2x1xf32>
    %69 = vector.broadcast %68 : vector<2x1xf32> to vector<2x128xf32>
    %70 = arith.mulf %66, %69 : vector<2x128xf32>
    %cst_28 = arith.constant 1.000000e-16 : f32
    %71 = vector.broadcast %cst_28 : f32 to vector<2x128xf32>
    %72 = arith.maximumf %70, %71 : vector<2x128xf32>
    %73 = math.rsqrt %72 : vector<2x128xf32>
    %74 = arith.mulf %64, %73 : vector<2x128xf32>
    %75 = vector.broadcast %26 : vector<2x1xf32> to vector<2x128xf32>
    %76 = arith.mulf %75, %74 : vector<2x128xf32>
    %cst_29 = arith.constant dense<0xFF800000> : vector<2xf32>
    %77 = vector.multi_reduction <maximumf>, %76, %cst_29 [1] : vector<2x128xf32> to vector<2xf32>
    %78 = vector.shape_cast %77 : vector<2xf32> to vector<2x1xf32>
    %79 = vector.broadcast %78 : vector<2x1xf32> to vector<2x128xf32>
    %80 = arith.subf %76, %79 : vector<2x128xf32>
    %81 = math.exp %80 : vector<2x128xf32>
    %cst_30 = arith.constant dense<0.000000e+00> : vector<2xf32>
    %82 = vector.multi_reduction <add>, %81, %cst_30 [1] : vector<2x128xf32> to vector<2xf32>
    %83 = vector.shape_cast %82 : vector<2xf32> to vector<2x1xf32>
    %84 = tpu.reciprocal %83 {approx = true} : vector<2x1xf32> -> vector<2x1xf32>
    %85 = vector.broadcast %84 : vector<2x1xf32> to vector<2x128xf32>
    %86 = arith.mulf %81, %85 : vector<2x128xf32>
    %87 = vector.broadcast %33 : vector<2x1xf32> to vector<2x128xf32>
    %88 = arith.mulf %87, %86 : vector<2x128xf32>
    %cst_31 = arith.constant 1.000000e+00 : f32
    %89 = vector.broadcast %cst_31 : f32 to vector<2x1xf32>
    %90 = arith.subf %89, %33 : vector<2x1xf32>
    %91 = vector.broadcast %90 : vector<2x1xf32> to vector<2x128xf32>
    %92 = arith.mulf %91, %1 : vector<2x128xf32>
    %93 = arith.addf %88, %92 : vector<2x128xf32>
    %c1_i32 = arith.constant 1 : i32
    %94 = tpu.dynamic_rotate %93 by %c1_i32 dim 1 : vector<2x128xf32>, i32 -> vector<2x128xf32>
    %c127_i32 = arith.constant 127 : i32
    %95 = tpu.dynamic_rotate %93 by %c127_i32 dim 1 : vector<2x128xf32>, i32 -> vector<2x128xf32>
    %96 = vector.extract_strided_slice %44 {offsets = [0, 0], sizes = [2, 1], strides = [1, 1]} : vector<2x3xf32> to vector<2x1xf32>
    %97 = vector.broadcast %96 : vector<2x1xf32> to vector<2x128xf32>
    %98 = arith.mulf %97, %94 : vector<2x128xf32>
    %99 = vector.extract_strided_slice %44 {offsets = [0, 1], sizes = [2, 1], strides = [1, 1]} : vector<2x3xf32> to vector<2x1xf32>
    %100 = vector.broadcast %99 : vector<2x1xf32> to vector<2x128xf32>
    %101 = arith.mulf %100, %93 : vector<2x128xf32>
    %102 = arith.addf %98, %101 : vector<2x128xf32>
    %103 = vector.extract_strided_slice %44 {offsets = [0, 2], sizes = [2, 1], strides = [1, 1]} : vector<2x3xf32> to vector<2x1xf32>
    %104 = vector.broadcast %103 : vector<2x1xf32> to vector<2x128xf32>
    %105 = arith.mulf %104, %95 : vector<2x128xf32>
    %106 = arith.addf %102, %105 : vector<2x128xf32>
    %cst_32 = arith.constant 1.000000e-16 : f32
    %107 = vector.broadcast %cst_32 : f32 to vector<2x128xf32>
    %108 = arith.maximumf %106, %107 : vector<2x128xf32>
    %109 = math.log %108 : vector<2x128xf32>
    %110 = vector.broadcast %56 : vector<2x1xf32> to vector<2x128xf32>
    %111 = arith.mulf %110, %109 : vector<2x128xf32>
    %112 = math.exp %111 : vector<2x128xf32>
    %cst_33 = arith.constant dense<0.000000e+00> : vector<2xf32>
    %113 = vector.multi_reduction <add>, %112, %cst_33 [1] : vector<2x128xf32> to vector<2xf32>
    %114 = vector.shape_cast %113 : vector<2xf32> to vector<2x1xf32>
    %cst_34 = arith.constant 1.000000e-16 : f32
    %115 = vector.broadcast %cst_34 : f32 to vector<2x1xf32>
    %116 = arith.addf %114, %115 : vector<2x1xf32>
    %117 = tpu.reciprocal %116 {approx = true} : vector<2x1xf32> -> vector<2x1xf32>
    %118 = vector.broadcast %117 : vector<2x1xf32> to vector<2x128xf32>
    %119 = arith.mulf %112, %118 : vector<2x128xf32>
    %120 = vector.shape_cast %119 : vector<2x128xf32> to vector<2x128x1xf32>
    %121 = vector.shape_cast %15 : vector<2x128xf32> to vector<2x1x128xf32>
    %122 = vector.broadcast %120 : vector<2x128x1xf32> to vector<2x128x128xf32>
    %123 = vector.broadcast %121 : vector<2x1x128xf32> to vector<2x128x128xf32>
    %124 = arith.mulf %122, %123 : vector<2x128x128xf32>
    %125 = vector.shape_cast %119 : vector<2x128xf32> to vector<2x128x1xf32>
    %126 = vector.shape_cast %16 : vector<2x128xf32> to vector<2x1x128xf32>
    %127 = vector.broadcast %125 : vector<2x128x1xf32> to vector<2x128x128xf32>
    %128 = vector.broadcast %126 : vector<2x1x128xf32> to vector<2x128x128xf32>
    %129 = arith.mulf %127, %128 : vector<2x128x128xf32>
    %c0_35 = arith.constant 0 : index
    %c0_36 = arith.constant 0 : index
    %130 = vector.load %arg5[%c0_35, %c0_36] : memref<2x128xf32, #tpu.memory_space<vmem>>, vector<2x128xf32>
    tpu.vector_store %arg5[%c0_35, %c0_36], %119 {strides = array<i32>} : memref<2x128xf32, #tpu.memory_space<vmem>>, vector<2x128xf32>,
    %cst_37 = arith.constant 1.000000e+00 : f32
    %131 = vector.broadcast %cst_37 : f32 to vector<2x128x128xf32>
    %132 = arith.subf %131, %124 : vector<2x128x128xf32>
    %133 = arith.mulf %2, %132 : vector<2x128x128xf32>
    %134 = arith.addf %133, %129 : vector<2x128x128xf32>
    %c0_38 = arith.constant 0 : index
    %c0_39 = arith.constant 0 : index
    %c0_40 = arith.constant 0 : index
    %135 = vector.load %arg6[%c0_38, %c0_39, %c0_40] : memref<2x128x128xf32, #tpu.memory_space<vmem>>, vector<2x128x128xf32>
    tpu.vector_store %arg6[%c0_38, %c0_39, %c0_40], %134 {strides = array<i32>} : memref<2x128x128xf32, #tpu.memory_space<vmem>>, vector<2x128x128xf32>,
    return
  }
}

</mosaic_0001>

<bundles_post_ra>
// kernel: write_head_forward.1
= control target key start
LH: loop header
LB: loop body
LE: loop exit
PB: predicated region body
PF: predicated region fallthrough
CT: control target
= control target key end

     0   :  { %12 = vsyncpa [#allocation3], 0  ;;  %s2508_s0 = inlined_call_operand.hbm [shape: f32[2,32], index: 0, kind: input, shape index: {}]   ;;  %s2509_s1 = inlined_call_operand.vmem [shape: f32[2,128], index: 1, kind: input, shape index: {}]   ;;  %s2510_s2 = inlined_call_operand.hbm [shape: f32[2,128,128], index: 2, kind: input, shape index: {}, may-alias: {2,6}]   ;;  %s2511_s3 = inlined_call_operand.hbm [shape: f32[32,512], index: 3, kind: input, shape index: {}]   ;;  %s2512_s4 = inlined_call_operand.vmem [shape: f32[1,512], index: 4, kind: input, shape index: {}]   ;;  %s2513_s5 = inlined_call_operand.hbm [shape: f32[2,128], index: 5, kind: output, shape index: {0}]   ;;  %s2514_s6 = inlined_call_operand.hbm [shape: f32[2,128,128], index: 6, kind: output, shape index: {1}, may-alias: {2,6}]  }
   0x1   :  { %13 = vsyncpa [#allocation6], 0 }
   0x2   :  { %14 = vsyncpa [#allocation4], 0 }
   0x3   :  { %15 = vsyncpa [#allocation10], 0  ;;  %s1732_s21 = smov [#allocation5]   ;;  %s1614_s25 = scalar_lea.hbm %s2510_s2, 4096 }
   0x4   :  { %s33_s22 = sshll.u32 %s1732_s21, 4  ;;  %p1615_p0 = scmp.ne.s32.totalorder %s2510_s2, %s1614_s25  ;;  %s34_s22 = int_to_ptr.vmem [resolvable:$true] %s33_s22 }
   0x5   :  { %p1618_p1 = scmp.lt.u32.totalorder %s1614_s25, %s2510_s2 }
   0x7   :  { %p1620_p2 = pnand %p1618_p1, %p1615_p0 }
   0x9   :  { %1623 = shalt.err (!%p1620_p2)
}
   0xa   :  { %s1624_s30 = scalar_lea.vmem %s34_s22, 4096  ;;  %p1629_p4 = scmp.lt.s32.totalorder %s34_s22, %s34_s22 }
   0xb   :  { %p1625_p3 = scmp.ne.s32.totalorder %s34_s22, %s1624_s30  ;;  %p1630_p5 = scmp.lt.s32.totalorder %s1624_s30, %s1624_s30 }
   0xd   :  { %p1631_p6 = por %p1630_p5, %p1629_p4 }
   0xf   :  { %p1632_p7 = pnand %p1631_p6, %p1625_p3 }
  0x11   :  { %1635 = shalt.err (!%p1632_p7)
}
  0x12   :  { %s1733_s7 = smov 128   ;;  %s1734_s8 = smov 8  }
  0x13   :  { %39 = dma.hbm_to_vmem [thread:$0]  %s2510_s2, 4096, %s34_s22, [#allocation6], %s1733_s7, %s1733_s7, %s1734_s8  }
  0x14   :  { %s1735_s11 = smov [#allocation2]   ;;  %s1736_s13 = smov [#allocation7]  }
  0x15   :  { %s22_s12 = sshll.u32 %s1735_s11, 4  ;;  %s45_s14 = sshll.u32 %s1736_s13, 4  ;;  %s23_s12 = int_to_ptr.vmem [resolvable:$true] %s22_s12  ;;  %s46_s14 = int_to_ptr.vmem [resolvable:$true] %s45_s14 }
  0x16   :  { %s1636_s17 = scalar_lea.hbm %s2508_s0, 32 }
  0x17   :  { %p1637_p8 = scmp.ne.s32.totalorder %s2508_s0, %s1636_s17  ;;  %p1640_p9 = scmp.lt.u32.totalorder %s1636_s17, %s2508_s0 }
  0x19   :  { %p1642_p10 = pnand %p1640_p9, %p1637_p8 }
  0x1b   :  { %1645 = shalt.err (!%p1642_p10)
}
  0x1c   :  { %s1646_s2 = scalar_lea.vmem %s23_s12, 32  ;;  %p1651_p12 = scmp.lt.s32.totalorder %s23_s12, %s23_s12 }
  0x1d   :  { %p1647_p11 = scmp.ne.s32.totalorder %s23_s12, %s1646_s2  ;;  %p1652_p13 = scmp.lt.s32.totalorder %s1646_s2, %s1646_s2 }
  0x1f   :  { %p1653_p0 = por %p1652_p13, %p1651_p12 }
  0x21   :  { %p1654_p1 = pnand %p1653_p0, %p1647_p11 }
  0x23   :  { %1657 = shalt.err (!%p1654_p1)
}
  0x24   :  { %25 = dma.hbm_to_vmem [thread:$0]  %s2508_s0, 32, %s23_s12, [#allocation3]  }
  0x25   :  { %s1658_s26 = scalar_lea.hbm %s2511_s3, 2048 }
  0x26   :  { %p1659_p2 = scmp.ne.s32.totalorder %s2511_s3, %s1658_s26  ;;  %p1662_p3 = scmp.lt.u32.totalorder %s1658_s26, %s2511_s3 }
  0x28   :  { %p1664_p4 = pnand %p1662_p3, %p1659_p2 }
  0x2a   :  { %1667 = shalt.err (!%p1664_p4)
}
  0x2b   :  { %s1668_s9 = scalar_lea.vmem %s46_s14, 2048  ;;  %p1673_p6 = scmp.lt.s32.totalorder %s46_s14, %s46_s14 }
  0x2c   :  { %p1669_p5 = scmp.ne.s32.totalorder %s46_s14, %s1668_s9  ;;  %p1674_p7 = scmp.lt.s32.totalorder %s1668_s9, %s1668_s9 }
  0x2e   :  { %p1675_p8 = por %p1674_p7, %p1673_p6 }
  0x30   :  { %p1676_p9 = pnand %p1675_p8, %p1669_p5 }
  0x32   :  { %1679 = shalt.err (!%p1676_p9)
}
  0x33   :  { %s1737_s0 = smov 512   ;;  %s1738_s10 = smov 32  }
  0x34   :  { %51 = dma.hbm_to_vmem [thread:$0]  %s2511_s3, 2048, %s46_s14, [#allocation6], %s1737_s0, %s1737_s0, %s1738_s10  }
  0x35   :  { %1724 = dma.done.wait [#allocation3], 32  }
  0x36   :  { %1725 = vsyncadd [#allocation3], 4294967264 }
  0x37   :  { %1726 = dma.done.wait [#allocation6], 6144  }
  0x38   :  { %1727 = vsyncadd [#allocation6], 4294961152  ;;  %v1739_v0 = vmov 0.0   ;;  %v98_v1 = vld [vmem:[#allocation7 + $0x8] sm:$0xff]  ;;  %v97_v3 = vld [vmem:[#allocation7] sm:$0xff]  ;;  %vm135_vm0 = vcmask 261120  }
  0x39   :  { %203 = vmatprep.mubr.f32.mxu0 %v1739_v0  ;;  %274 = vmatprep.mubr.f32.mxu1 %v1739_v0  ;;  %v102_v2 = vld [vmem:[#allocation7 + $0x28] sm:$0xff]  ;;  %v101_v5 = vld [vmem:[#allocation7 + $0x20] sm:$0xff]  ;;  %v100_v12 = vld [vmem:[#allocation7 + $0x18] sm:$0xff]  ;;  %vm582_vm1 = vcmask 1040384   ;;  %vm299_vm2 = vcmask 33808   ;;  %vm773_vm4 = vcmask 130112  }
  0x3a   :  { %v1448_v4 = vpack.c.bf16 %v102_v2, %v98_v1  ;;  %v106_v6 = vld [vmem:[#allocation7 + $0x48] sm:$0xff]  ;;  %v1450_v8 = vpack.c.bf16 %v101_v5, %v97_v3  ;;  %v105_v10 = vld [vmem:[#allocation7 + $0x40] sm:$0xff]  ;;  %v104_v13 = vld [vmem:[#allocation7 + $0x38] sm:$0xff]  ;;  %vm780_vm5 = vcmask 195712   ;;  %vm787_vm6 = vcmask 261312   ;;  %s1748_s16 = smov 1  }
  0x3b   :  { %v110_v7 = vld [vmem:[#allocation7 + $0x68] sm:$0xff]  ;;  %v109_v11 = vld [vmem:[#allocation7 + $0x60] sm:$0xff]  ;;  %v99_v14 = vld [vmem:[#allocation7 + $0x10] sm:$0xff]  ;;  %v1456_v16 = vpack.c.bf16 %v104_v13, %v100_v12  ;;  %vm794_vm7 = vcmask 326912   ;;  %vm801_vm8 = vcmask 392512   ;;  %vm808_vm9 = vcmask 458112  }
  0x3c   :  { %v1452_v9 = vpack.c.bf16 %v110_v7, %v106_v6  ;;  %1449 = vmatprep.subr.bf16.mxu0 %v1448_v4  ;;  %v1454_v15 = vpack.c.bf16 %v109_v11, %v105_v10  ;;  %v103_v17 = vld [vmem:[#allocation7 + $0x30] sm:$0xff]  ;;  %v108_v18 = vld [vmem:[#allocation7 + $0x58] sm:$0xff]  ;;  %v65_v24 = vld [vmem:[#allocation5] sm:$0xff]  ;;  %vm815_vm10 = vcmask 523712   ;;  %vm822_vm11 = vcmask 589312   ;;  %s1749_s17 = smov 127  }
  0x3d   :  { %1451 = vmatpush1.bf16.msra.mxu0 %v1450_v8  ;;  %v112_v19 = vld [vmem:[#allocation7 + $0x78] sm:$0xff]  ;;  %v1458_v20 = vpack.c.bf16 %v103_v17, %v99_v14  ;;  %v107_v22 = vld [vmem:[#allocation7 + $0x50] sm:$0xff]  ;;  %1457 = vmatprep.subr.bf16.mxu1 %v1456_v16  ;;  %v1826_v25 = vadd.f32 1e-16, %v65_v24  ;;  %v66_v26 = vld [vmem:[#allocation5 + $0x8] sm:$0xff]  ;;  %vm829_vm12 = vcmask 654912  }
  0x3e   :  { %1453 = vmatprep.subr.bf16.mxu0 %v1452_v9  ;;  %v1460_v21 = vpack.c.bf16 %v112_v19, %v108_v18  ;;  %v111_v23 = vld [vmem:[#allocation7 + $0x70] sm:$0xff]  ;;  %v81_v27 = vld [vmem:[#allocation5 + $0x80] sm:$0xff]  ;;  %v1828_v29 = vadd.f32 1e-16, %v66_v26  ;;  %v82_v31 = vld [vmem:[#allocation5 + $0x88] sm:$0xff]  ;;  %vm836_vm13 = vcmask 720512  }
  0x3f   :  { %1459 = vmatpush1.bf16.msra.mxu1 %v1458_v20  ;;  %v1462_v28 = vpack.c.bf16 %v111_v23, %v107_v22  ;;  %v1830_v30 = vadd.f32 1e-16, %v81_v27  ;;  %v63_v32 = vld [vmem:[#allocation2] sm:$0x3]  ;;  %v484_v33 = vmul.f32 %v1826_v25, %v1826_v25  ;;  %v67_v34 = vld [vmem:[#allocation5 + $0x10] sm:$0xff]  ;;  %v69_v43 = vld [vmem:[#allocation5 + $0x20] sm:$0xff] }
  0x40   :  { %1461 = vmatprep.subr.bf16.mxu1 %v1460_v21  ;;  %v1836_v36 = vadd.f32 1e-16, %v67_v34  ;;  %v68_v37 = vld [vmem:[#allocation5 + $0x18] sm:$0xff]  ;;  %v485_v38 = vmul.f32 %v1828_v29, %v1828_v29  ;;  %v1840_v39 = vadd.f32 1e-16, %v82_v31  ;;  %v83_v40 = vld [vmem:[#allocation5 + $0x90] sm:$0xff] }
  0x41   :  { %1455 = vmatpush1.bf16.msra.mxu0 %v1454_v15  ;;  %v500_v35 = vmul.f32 %v1830_v30, %v1830_v30  ;;  %516 = vadd.xlane.f32.xlu1 %v484_v33  ;;  %v1845_v42 = vadd.f32 1e-16, %v68_v37  ;;  %v1850_v45 = vadd.f32 1e-16, %v83_v40  ;;  %v84_v46 = vld [vmem:[#allocation5 + $0x98] sm:$0xff]  ;;  %v70_v49 = vld [vmem:[#allocation5 + $0x28] sm:$0xff] }
  0x42   :  { %v486_v41 = vmul.f32 %v1836_v36, %v1836_v36  ;;  %v501_v44 = vmul.f32 %v1840_v39, %v1840_v39  ;;  %v1854_v48 = vadd.f32 1e-16, %v69_v43  ;;  %v1858_v51 = vadd.f32 1e-16, %v84_v46  ;;  %v85_v52 = vld [vmem:[#allocation5 + $0xa0] sm:$0xff]  ;;  %v71_v55 = vld [vmem:[#allocation5 + $0x30] sm:$0xff] }
  0x43   :  { %1463 = vmatpush1.bf16.msra.mxu1 %v1462_v28  ;;  %548 = vadd.xlane.f32.xlu0 %v500_v35  ;;  %v487_v47 = vmul.f32 %v1845_v42, %v1845_v42  ;;  %v502_v50 = vmul.f32 %v1850_v45, %v1850_v45  ;;  %v1862_v54 = vadd.f32 1e-16, %v70_v49  ;;  %v1866_v57 = vadd.f32 1e-16, %v85_v52  ;;  %v86_v58 = vld [vmem:[#allocation5 + $0xa8] sm:$0xff]  ;;  %v72_v61 = vld [vmem:[#allocation5 + $0x38] sm:$0xff] }
  0x44   :  { %1446 = vmatmul.mubr.msk.f32.vlgmr.msra.gmra.mrb[0].mxu0 %vm135_vm0, %v63_v32  ;;  %v488_v53 = vmul.f32 %v1854_v48, %v1854_v48  ;;  %v503_v56 = vmul.f32 %v1858_v51, %v1858_v51  ;;  %v1870_v60 = vadd.f32 1e-16, %v71_v55  ;;  %v1874_v63 = vadd.f32 1e-16, %v86_v58  ;;  %v87_v0 = vld [vmem:[#allocation5 + $0xb0] sm:$0xff]  ;;  %v73_v3 = vld [vmem:[#allocation5 + $0x40] sm:$0xff] }
  0x45   :  { %518 = vadd.xlane.f32.xlu1 %v485_v38  ;;  %v489_v59 = vmul.f32 %v1862_v54, %v1862_v54  ;;  %v504_v62 = vmul.f32 %v1866_v57, %v1866_v57  ;;  %v1878_v2 = vadd.f32 1e-16, %v72_v61  ;;  %v1882_v5 = vadd.f32 1e-16, %v87_v0  ;;  %v88_v6 = vld [vmem:[#allocation5 + $0xb8] sm:$0xff]  ;;  %v74_v9 = vld [vmem:[#allocation5 + $0x48] sm:$0xff] }
  0x46   :  { %1447 = vmatmul.mubr.msk.f32.vlgmr.msra.gmra.mrb[0].mxu1 %vm135_vm0, %v63_v32  ;;  %v490_v1 = vmul.f32 %v1870_v60, %v1870_v60  ;;  %v505_v4 = vmul.f32 %v1874_v63, %v1874_v63  ;;  %v1886_v8 = vadd.f32 1e-16, %v73_v3  ;;  %v1890_v11 = vadd.f32 1e-16, %v88_v6  ;;  %v89_v12 = vld [vmem:[#allocation5 + $0xc0] sm:$0xff]  ;;  %v75_v15 = vld [vmem:[#allocation5 + $0x50] sm:$0xff] }
  0x47   :  { %520 = vadd.xlane.f32.xlu0 %v486_v41  ;;  %v491_v7 = vmul.f32 %v1878_v2, %v1878_v2  ;;  %v506_v10 = vmul.f32 %v1882_v5, %v1882_v5  ;;  %v1894_v14 = vadd.f32 1e-16, %v74_v9  ;;  %v1898_v17 = vadd.f32 1e-16, %v89_v12  ;;  %v90_v18 = vld [vmem:[#allocation5 + $0xc8] sm:$0xff]  ;;  %v76_v21 = vld [vmem:[#allocation5 + $0x58] sm:$0xff] }
  0x48   :  { %v492_v13 = vmul.f32 %v1886_v8, %v1886_v8  ;;  %v507_v16 = vmul.f32 %v1890_v11, %v1890_v11  ;;  %v1902_v20 = vadd.f32 1e-16, %v75_v15  ;;  %v1906_v23 = vadd.f32 1e-16, %v90_v18  ;;  %v91_v24 = vld [vmem:[#allocation5 + $0xd0] sm:$0xff]  ;;  %v77_v28 = vld [vmem:[#allocation5 + $0x60] sm:$0xff] }
  0x49   :  { %550 = vadd.xlane.f32.xlu1 %v501_v44  ;;  %v493_v19 = vmul.f32 %v1894_v14, %v1894_v14  ;;  %v508_v22 = vmul.f32 %v1898_v17, %v1898_v17  ;;  %v1910_v27 = vadd.f32 1e-16, %v76_v21  ;;  %v1914_v32 = vadd.f32 1e-16, %v91_v24  ;;  %v92_v33 = vld [vmem:[#allocation5 + $0xd8] sm:$0xff]  ;;  %v78_v37 = vld [vmem:[#allocation5 + $0x68] sm:$0xff] }
  0x4a   :  { %v494_v26 = vmul.f32 %v1902_v20, %v1902_v20  ;;  %v509_v31 = vmul.f32 %v1906_v23, %v1906_v23  ;;  %v1918_v35 = vadd.f32 1e-16, %v77_v28  ;;  %v1922_v40 = vadd.f32 1e-16, %v92_v33  ;;  %v93_v41 = vld [vmem:[#allocation5 + $0xe0] sm:$0xff]  ;;  %v94_v52 = vld [vmem:[#allocation5 + $0xe8] sm:$0xff] }
  0x4b   :  { %522 = vadd.xlane.f32.xlu0 %v487_v47  ;;  %v495_v34 = vmul.f32 %v1910_v27, %v1910_v27  ;;  %v510_v38 = vmul.f32 %v1914_v32, %v1914_v32  ;;  %v1926_v44 = vadd.f32 1e-16, %v78_v37  ;;  %v1930_v47 = vadd.f32 1e-16, %v93_v41 }
  0x4c   :  { %v496_v43 = vmul.f32 %v1918_v35, %v1918_v35  ;;  %v511_v46 = vmul.f32 %v1922_v40, %v1922_v40  ;;  %v115_v12 = vlaneseq  ;;  %v1741_v15 = vmov 1966171168  }
  0x4d   :  { %552 = vadd.xlane.f32.xlu1 %v502_v50  ;;  %v497_v49 = vmul.f32 %v1926_v44, %v1926_v44  ;;  %v512_v50 = vmul.f32 %v1930_v47, %v1930_v47  ;;  %vm843_vm14 = vcmask 786112   ;;  %vm850_vm15 = vcmask 851712  }
  0x4e   :  { %vm857_vm0 = vcmask 917312  }
  0x4f   :  { %524 = vadd.xlane.f32.xlu0 %v488_v53  ;;  %v1936_v53 = vadd.f32 1e-16, %v94_v52 }
  0x51   :  { %554 = vadd.xlane.f32.xlu1 %v503_v56  ;;  %v513_v55 = vmul.f32 %v1936_v53, %v1936_v53  ;;  %v79_v56 = vld [vmem:[#allocation5 + $0x70] sm:$0xff] }
  0x52   :  { %v1940_v58 = vadd.f32 1e-16, %v79_v56 }
  0x53   :  { %526 = vadd.xlane.f32.xlu0 %v489_v59  ;;  %v95_v59 = vld [vmem:[#allocation5 + $0xf0] sm:$0xff] }
  0x54   :  { %v1942_v61 = vadd.f32 1e-16, %v95_v59 }
  0x55   :  { %556 = vadd.xlane.f32.xlu1 %v504_v62  ;;  %v498_v62 = vmul.f32 %v1940_v58, %v1940_v58 }
  0x56   :  { %v514_v0 = vmul.f32 %v1942_v61, %v1942_v61 }
  0x57   :  { %528 = vadd.xlane.f32.xlu0 %v490_v1  ;;  %v80_v1 = vld [vmem:[#allocation5 + $0x78] sm:$0xff] }
  0x58   :  { %v1948_v3 = vadd.f32 1e-16, %v80_v1 }
  0x59   :  { %558 = vadd.xlane.f32.xlu1 %v505_v4  ;;  %v96_v4 = vld [vmem:[#allocation5 + $0xf8] sm:$0xff] }
  0x5a   :  { %v1950_v6 = vadd.f32 1e-16, %v96_v4 }
  0x5b   :  { %530 = vadd.xlane.f32.xlu0 %v491_v7  ;;  %v499_v7 = vmul.f32 %v1948_v3, %v1948_v3 }
  0x5c   :  { %v515_v9 = vmul.f32 %v1950_v6, %v1950_v6 }
  0x5d   :  { %560 = vadd.xlane.f32.xlu1 %v506_v10  ;;  %v1740_v10 = vmov 0  }
  0x5e   :  { %1484 = vset.pattern.permute.xlu0 %v1740_v10 }
  0x5f   :  { %532 = vadd.xlane.f32.xlu0 %v492_v13  ;;  %v1957_v13 = vshrl.u32 %v115_v12, 7 }
  0x61   :  { %562 = vadd.xlane.f32.xlu1 %v507_v16  ;;  %v351_v16 = vunpack.c.l.s4 %v1741_v15  ;;  %v1960_v18 = vsub.s32 0, %v1957_v13  ;;  %v2515_v21 = vsub.s32 1, %v1957_v13  ;;  %v125_v24 = vsub.s32 2, %v1957_v13 }
  0x63   :  { %534 = vadd.xlane.f32.xlu0 %v493_v19  ;;  %v1965_v19 = vld [vmem:[%s2512_s4] sm:$0xf]  ;;  %s1742_s4 = smov 126  }
  0x64   :  { %v122_v28 = vrot.slane %v1965_v19, %v2515_v21 }
  0x65   :  { %564 = vadd.xlane.f32.xlu1 %v508_v22  ;;  %v352_v22 = vunpack.c.0.s8 %v351_v16 }
  0x67   :  { %536 = vadd.xlane.f32.xlu0 %v494_v26  ;;  %v118_v26 = vrot.slane %v1965_v19, %v1960_v18 }
  0x69   :  { %566 = vadd.xlane.f32.xlu1 %v509_v31  ;;  %v1975_v31 = vsub.s32 %v352_v22, %v1957_v13 }
  0x6b   :  { %538 = vadd.xlane.f32.xlu0 %v495_v34  ;;  %2524 = vst [vmem:[#allocation15_spill] sm:$0xff] %v1975_v31  ;;  %v126_v34 = vrot.slane %v1965_v19, %v125_v24 }
  0x6d   :  { %568 = vadd.xlane.f32.xlu1 %v510_v38 }
  0x6f   :  { %540 = vadd.xlane.f32.xlu0 %v496_v43 }
  0x71   :  { %570 = vadd.xlane.f32.xlu1 %v511_v46 }
  0x73   :  { %542 = vadd.xlane.f32.xlu0 %v497_v49 }
  0x75   :  { %572 = vadd.xlane.f32.xlu1 %v512_v50 }
  0x77   :  { %544 = vadd.xlane.f32.xlu0 %v498_v62 }
  0x79   :  { %574 = vadd.xlane.f32.xlu1 %v513_v55 }
  0x7b   :  { %546 = vadd.xlane.f32.xlu0 %v499_v7 }
  0x7d   :  { %576 = vadd.xlane.f32.xlu1 %v514_v0 }
  0x81   :  { %578 = vadd.xlane.f32.xlu1 %v515_v9 }
 0x117   :  { %v205_v33 = vpop.f32.mrb[0].mxu0 }
 0x118   :  { %v206_v37 = vadd.f32 %v205_v33, %v118_v26  ;;  %v207_v38 = vpop.f32.mrb[1].mxu0 }
 0x119   :  { %v208_v41 = vadd.f32 %v207_v38, %v122_v28  ;;  %v276_v46 = vpop.f32.mrb[0].mxu1 }
 0x11a   :  { %v356_v43 = vrot.slane %v206_v37, %v1975_v31  ;;  %v277_v50 = vadd.f32 %v276_v46, %v126_v34  ;;  %v1979_v52 = vpop.f32.mrb[1].mxu1 }
 0x11b   :  { %v281_v49 = vsub.f32 0.0, %v208_v41 }
 0x11c   :  { %v357_v55 = vcombine.high %v356_v43, %v356_v43  ;;  %v364_v56 = vrot.slane %v356_v43, %v1975_v31  ;;  %v1983_v62 = vrot.slane %v277_v50, %v1975_v31 }
 0x11d   :  { %v282_v59 = vmul.f32 1.442695, %v281_v49 }
 0x11e   :  { %2525 = vst [vmem:[#allocation16_spill] sm:$0xff] %v1983_v62  ;;  %v371_v0 = vrot.slane %v357_v55, %v1975_v31  ;;  %v374_v1 = vadd.f32 1e-16, %v364_v56  ;;  %v1228_v4 = vcombine.high %v1983_v62, %v1983_v62 }
 0x11f   :  { %1492 = vpow2.f32 %v282_v59  ;;  %v2057_v59 = vpop.xlane.xlu1 %516 }
 0x120   :  { %v1990_v9 = vadd.f32 1e-16, %v371_v0  ;;  %v580_v10 = vmul.f32 %v374_v1, %v374_v1  ;;  %v1993_v15 = vrot.slane %v374_v1, %v1960_v18  ;;  %v1996_v16 = vrot.slane %v1228_v4, %v1975_v31  ;;  %v2078_v4 = vpop.xlane.xlu0 %548 }
 0x122   :  { %2526 = vst [vmem:[#allocation17_spill] sm:$0xff] %v1996_v16  ;;  %v2000_v22 = vrot.slane %v1990_v9, %v1960_v18  ;;  %v583_v24 = vsel %vm582_vm1, %v580_v10, 0.0  ;;  %v389_v26 = vmul.f32 %v1993_v15, %v1828_v29  ;;  %v388_v28 = vmul.f32 %v1993_v15, %v1826_v25 }
 0x123   :  { %584 = vadd.xlane.f32.xlu0 %v583_v24  ;;  %v390_v37 = vmul.f32 %v1993_v15, %v1836_v36  ;;  %v391_v29 = vmul.f32 %v1993_v15, %v1845_v42  ;;  %v396_v55 = vmul.f32 %v1993_v15, %v1886_v8  ;;  %v581_v1 = vmul.f32 %v1990_v9, %v1990_v9 }
 0x124   :  { %422 = vadd.xlane.f32.xlu1 %v389_v26  ;;  %v405_v33 = vmul.f32 %v2000_v22, %v1840_v39  ;;  %v406_v41 = vmul.f32 %v2000_v22, %v1850_v45  ;;  %v407_v25 = vmul.f32 %v2000_v22, %v1858_v51  ;;  %v392_v39 = vmul.f32 %v1993_v15, %v1854_v48  ;;  %v521_v24 = vpop.xlane.xlu0 %520 }
 0x125   :  { %v408_v36 = vmul.f32 %v2000_v22, %v1866_v57  ;;  %v393_v45 = vmul.f32 %v1993_v15, %v1862_v54  ;;  %v409_v42 = vmul.f32 %v2000_v22, %v1874_v63  ;;  %v394_v57 = vmul.f32 %v1993_v15, %v1870_v60 }
 0x126   :  { %v410_v54 = vmul.f32 %v2000_v22, %v1882_v5  ;;  %v395_v63 = vmul.f32 %v1993_v15, %v1878_v2  ;;  %v411_v50 = vmul.f32 %v2000_v22, %v1890_v11  ;;  %v412_v60 = vmul.f32 %v2000_v22, %v1898_v17 }
 0x127   :  { %420 = vadd.xlane.f32.xlu0 %v388_v28  ;;  %v397_v5 = vmul.f32 %v1993_v15, %v1894_v14  ;;  %v413_v56 = vmul.f32 %v2000_v22, %v1906_v23  ;;  %v129_v2 = vsub.s32 3, %v1957_v13  ;;  %v398_v11 = vmul.f32 %v1993_v15, %v1902_v20 }
 0x128   :  { %454 = vadd.xlane.f32.xlu1 %v405_v33  ;;  %v414_v17 = vmul.f32 %v2000_v22, %v1914_v32  ;;  %v399_v14 = vmul.f32 %v1993_v15, %v1910_v27  ;;  %v415_v0 = vmul.f32 %v2000_v22, %v1922_v40  ;;  %v400_v20 = vmul.f32 %v1993_v15, %v1918_v35  ;;  %v523_v33 = vpop.xlane.xlu0 %522 }
 0x129   :  { %v1493_v34 = vpop.eup %1492  ;;  %v130_v8 = vrot.slane %v1965_v19, %v129_v2  ;;  %v2068_v19 = vpop.xlane.xlu1 %518  ;;  %v416_v32 = vmul.f32 %v2000_v22, %v1930_v47  ;;  %v417_v40 = vmul.f32 %v2000_v22, %v1936_v53  ;;  %v401_v47 = vmul.f32 %v1993_v15, %v1926_v44 }
 0x12a   :  { %v284_v38 = vadd.f32 1.0, %v1493_v34  ;;  %v418_v9 = vmul.f32 %v2000_v22, %v1942_v61  ;;  %v402_v53 = vmul.f32 %v1993_v15, %v1940_v58  ;;  %v419_v28 = vmul.f32 %v2000_v22, %v1950_v6 }
 0x12b   :  { %424 = vadd.xlane.f32.xlu0 %v390_v37  ;;  %v2062_v23 = vadd.f32 %v1979_v52, %v130_v8  ;;  %v586_v52 = vsel %vm582_vm1, %v581_v1, 0.0  ;;  %v403_v44 = vmul.f32 %v1993_v15, %v1948_v3  ;;  %v404_v58 = vmul.f32 %v2000_v22, %v1830_v30 }
 0x12c   :  { %1494 = vrcp.f32 %v284_v38  ;;  %456 = vadd.xlane.f32.xlu1 %v406_v41  ;;  %v525_v6 = vpop.xlane.xlu0 %524  ;;  %vm864_vm1 = vcmask 982912  }
 0x12d   :  { %2529 = vst [vmem:[#allocation20_spill] sm:$0xff] %v2062_v23  ;;  %v287_v27 = vmin.f32 %v2062_v23, 20.0  ;;  %v2080_v10 = vpop.xlane.xlu1 %550  ;;  %v300_v61 = vsel %vm299_vm2, %v2062_v23, -inf  ;;  %vm286_vm3 = vcmp.gt.f32.partialorder %v2062_v23, 20.0  ;;  %vm871_vm2 = vcmask 1048512  }
 0x12f   :  { %426 = vadd.xlane.f32.xlu0 %v391_v29  ;;  %v288_v35 = vmul.f32 1.442695, %v287_v27 }
 0x130   :  { %458 = vadd.xlane.f32.xlu1 %v407_v25  ;;  %v527_v29 = vpop.xlane.xlu0 %526 }
 0x131   :  { %1496 = vpow2.f32 %v288_v35  ;;  %v2088_v26 = vpop.xlane.xlu1 %552 }
 0x133   :  { %428 = vadd.xlane.f32.xlu0 %v392_v39 }
 0x134   :  { %460 = vadd.xlane.f32.xlu1 %v408_v36  ;;  %v529_v3 = vpop.xlane.xlu0 %528 }
 0x135   :  { %v2095_v34 = vpop.xlane.xlu1 %554 }
 0x136   :  { %v1495_v43 = vpop.eup %1494 }
 0x137   :  { %v2026_v46 = vrot.slane %v1495_v43, %v1975_v31  ;;  %430 = vadd.xlane.f32.xlu0 %v393_v45 }
 0x138   :  { %462 = vadd.xlane.f32.xlu1 %v409_v42  ;;  %v531_v45 = vpop.xlane.xlu0 %530 }
 0x139   :  { %2527 = vst [vmem:[#allocation18_spill] sm:$0xff] %v2026_v46  ;;  %v1163_v48 = vcombine.high %v2026_v46, %v2026_v46  ;;  %v2099_v41 = vpop.xlane.xlu1 %556 }
 0x13b   :  { %v2037_v49 = vrot.slane %v1163_v48, %v1975_v31  ;;  %432 = vadd.xlane.f32.xlu0 %v394_v57  ;;  %v1497_v37 = vpop.eup %1496 }
 0x13c   :  { %464 = vadd.xlane.f32.xlu1 %v410_v54  ;;  %v290_v38 = vadd.f32 1.0, %v1497_v37  ;;  %v533_v22 = vpop.xlane.xlu0 %532 }
 0x13d   :  { %2528 = vst [vmem:[#allocation19_spill] sm:$0xff] %v2037_v49  ;;  %v2101_v25 = vpop.xlane.xlu1 %558 }
 0x13e   :  { %1498 = vlog2.f32 %v290_v38 }
 0x13f   :  { %434 = vadd.xlane.f32.xlu0 %v395_v63 }
 0x140   :  { %466 = vadd.xlane.f32.xlu1 %v411_v50  ;;  %v535_v48 = vpop.xlane.xlu0 %534 }
 0x141   :  { %v2103_v39 = vpop.xlane.xlu1 %560 }
 0x143   :  { %436 = vadd.xlane.f32.xlu0 %v396_v55 }
 0x144   :  { %468 = vadd.xlane.f32.xlu1 %v412_v60  ;;  %v537_v54 = vpop.xlane.xlu0 %536 }
 0x145   :  { %v2106_v43 = vpop.xlane.xlu1 %562 }
 0x147   :  { %438 = vadd.xlane.f32.xlu0 %v397_v5 }
 0x148   :  { %470 = vadd.xlane.f32.xlu1 %v413_v56  ;;  %v1499_v15 = vpop.eup %1498  ;;  %v539_v50 = vpop.xlane.xlu0 %538 }
 0x149   :  { %v292_v36 = vmul.f32 0.6931472, %v1499_v15  ;;  %v2112_v42 = vpop.xlane.xlu1 %564 }
 0x14b   :  { %440 = vadd.xlane.f32.xlu0 %v398_v11  ;;  %v2109_v30 = vsel %vm286_vm3, %v2062_v23, %v292_v36  ;;  %v2161_v36 = vand.u32 127, %v115_v12  ;;  %vm952_vm3 = vcmask 1041409  }
 0x14c   :  { %472 = vadd.xlane.f32.xlu1 %v414_v17  ;;  %2530 = vst [vmem:[#allocation21_spill] sm:$0xff] %v2109_v30  ;;  %v2120_v60 = vpop.xlane.xlu0 %540 }
 0x14d   :  { %v2114_v57 = vpop.xlane.xlu1 %566  ;;  %v782_v49 = vadd.s32 4294967272, %v2161_v36 }
 0x14f   :  { %442 = vadd.xlane.f32.xlu0 %v399_v14 }
 0x150   :  { %474 = vadd.xlane.f32.xlu1 %v415_v0  ;;  %v2124_v56 = vpop.xlane.xlu0 %542 }
 0x151   :  { %v2116_v63 = vpop.xlane.xlu1 %568 }
 0x153   :  { %444 = vadd.xlane.f32.xlu0 %v400_v20 }
 0x154   :  { %476 = vadd.xlane.f32.xlu1 %v416_v32  ;;  %v2128_v11 = vpop.xlane.xlu0 %544 }
 0x155   :  { %v2118_v55 = vpop.xlane.xlu1 %570 }
 0x157   :  { %587 = vadd.xlane.f32.xlu0 %v586_v52 }
 0x158   :  { %478 = vadd.xlane.f32.xlu1 %v417_v40  ;;  %v2132_v17 = vpop.xlane.xlu0 %546 }
 0x159   :  { %v2122_v5 = vpop.xlane.xlu1 %572 }
 0x15b   :  { %446 = vadd.xlane.f32.xlu0 %v401_v47 }
 0x15c   :  { %480 = vadd.xlane.f32.xlu1 %v418_v9 }
 0x15d   :  { %v2126_v2 = vpop.xlane.xlu1 %574 }
 0x15f   :  { %448 = vadd.xlane.f32.xlu0 %v402_v53 }
 0x160   :  { %482 = vadd.xlane.f32.xlu1 %v419_v28 }
 0x161   :  { %v2130_v8 = vpop.xlane.xlu1 %576 }
 0x163   :  { %450 = vadd.xlane.f32.xlu0 %v403_v44 }
 0x164   :  { %301 = vmax.xlane.f32.xlu1 %v300_v61 }
 0x165   :  { %v2134_v14 = vpop.xlane.xlu1 %578 }
 0x167   :  { %452 = vadd.xlane.f32.xlu0 %v404_v58 }
 0x17d   :  { %727 = vperm.xlu0 %1484, %v2109_v30  }
 0x1b0   :  { %v585_v0 = vpop.xlane.xlu0 %584 }
 0x1b1   :  { %v423_v20 = vpop.xlane.xlu1 %422  ;;  %v2139_v27 = vrot.slane %v585_v0, %v1960_v18 }
 0x1b3   :  { %v598_v35 = vmul.f32 %v2139_v27, %v2068_v19  ;;  %v597_v47 = vmul.f32 %v2139_v27, %v2057_v59  ;;  %v599_v44 = vmul.f32 %v2139_v27, %v521_v24  ;;  %v600_v38 = vmul.f32 %v2139_v27, %v523_v33 }
 0x1b4   :  { %v421_v32 = vpop.xlane.xlu0 %420  ;;  %v601_v59 = vmul.f32 %v2139_v27, %v525_v6  ;;  %v603_v33 = vmul.f32 %v2139_v27, %v529_v3  ;;  %v605_v12 = vmul.f32 %v2139_v27, %v533_v22  ;;  %v606_v51 = vmul.f32 %v2139_v27, %v535_v48 }
 0x1b5   :  { %v2136_v1 = vpop.xlane.xlu1 %454  ;;  %v630_v28 = vmax.f32 %v598_v35, 1e-16  ;;  %v629_v61 = vmax.f32 %v597_v47, 1e-16  ;;  %v631_v58 = vmax.f32 %v599_v44, 1e-16  ;;  %v602_v35 = vmul.f32 %v2139_v27, %v527_v29 }
 0x1b6   :  { %v632_v0 = vmax.f32 %v600_v38, 1e-16  ;;  %v768_v44 = vadd.s32 4294967288, %v2161_v36  ;;  %v635_v29 = vmax.f32 %v603_v33, 1e-16 }
 0x1b7   :  { %1500 = vrsqrt.f32 %v630_v28  ;;  %v633_v28 = vmax.f32 %v601_v59, 1e-16  ;;  %v634_v7 = vmax.f32 %v602_v35, 1e-16  ;;  %v607_v59 = vmul.f32 %v2139_v27, %v537_v54 }
 0x1b8   :  { %v425_v52 = vpop.xlane.xlu0 %424  ;;  %1502 = vrsqrt.f32 %v629_v61  ;;  %v604_v61 = vmul.f32 %v2139_v27, %v531_v45  ;;  %v2177_v3 = vsub.s32 %v768_v44, %v1957_v13  ;;  %v775_v45 = vadd.s32 4294967280, %v2161_v36 }
 0x1b9   :  { %v2141_v40 = vpop.xlane.xlu1 %456  ;;  %1504 = vrsqrt.f32 %v631_v58  ;;  %v637_v33 = vmax.f32 %v605_v12, 1e-16  ;;  %v608_v54 = vmul.f32 %v2139_v27, %v539_v50  ;;  %v638_v44 = vmax.f32 %v606_v51, 1e-16 }
 0x1ba   :  { %1506 = vrsqrt.f32 %v632_v0  ;;  %v2181_v0 = vsub.s32 %v2161_v36, %v1957_v13  ;;  %v636_v22 = vmax.f32 %v604_v61, 1e-16  ;;  %v639_v62 = vmax.f32 %v607_v59, 1e-16 }
 0x1bb   :  { %1508 = vrsqrt.f32 %v633_v28  ;;  %v2191_v31 = vsub.s32 %v775_v45, %v1957_v13  ;;  %v640_v51 = vmax.f32 %v608_v54, 1e-16  ;;  %v796_v12 = vadd.s32 4294967256, %v2161_v36 }
 0x1bc   :  { %v2147_v9 = vpop.xlane.xlu0 %426  ;;  %1510 = vrsqrt.f32 %v634_v7  ;;  %v2209_v45 = vsub.s32 %v782_v49, %v1957_v13  ;;  %v824_v49 = vadd.s32 4294967224, %v2161_v36 }
 0x1bd   :  { %v2149_v53 = vpop.xlane.xlu1 %458  ;;  %1512 = vrsqrt.f32 %v635_v29  ;;  %v610_v29 = vmul.f32 %v2139_v27, %v2124_v56 }
 0x1be   :  { %1514 = vrsqrt.f32 %v636_v22  ;;  %v817_v22 = vadd.s32 4294967232, %v2161_v36 }
 0x1bf   :  { %1516 = vrsqrt.f32 %v637_v33 }
 0x1c0   :  { %v2152_v37 = vpop.xlane.xlu0 %428  ;;  %1518 = vrsqrt.f32 %v638_v44  ;;  %v831_v44 = vadd.s32 4294967216, %v2161_v36 }
 0x1c1   :  { %v2155_v15 = vpop.xlane.xlu1 %460  ;;  %v1501_v6 = vpop.eup %1500  ;;  %1520 = vrsqrt.f32 %v639_v62  ;;  %v611_v62 = vmul.f32 %v2139_v27, %v2128_v11 }
 0x1c2   :  { %v1503_v38 = vpop.eup %1502  ;;  %v694_v48 = vmul.f32 %v1501_v6, %v423_v20  ;;  %v609_v20 = vmul.f32 %v2139_v27, %v2120_v60  ;;  %v789_v6 = vadd.s32 4294967264, %v2161_v36  ;;  %v810_v60 = vadd.s32 4294967240, %v2161_v36 }
 0x1c3   :  { %v1505_v35 = vpop.eup %1504  ;;  %v693_v28 = vmul.f32 %v1503_v38, %v421_v32  ;;  %1522 = vrsqrt.f32 %v640_v51 }
 0x1c4   :  { %v2157_v19 = vpop.xlane.xlu0 %430  ;;  %v695_v61 = vmul.f32 %v1505_v35, %v425_v52  ;;  %v772_v50 = vrot.slane %v694_v48, %v2177_v3  ;;  %v1507_v32 = vpop.eup %1506  ;;  %v803_v52 = vadd.s32 4294967248, %v2161_v36  ;;  %v641_v48 = vmax.f32 %v609_v20, 1e-16 }
 0x1c5   :  { %v2166_v47 = vpop.xlane.xlu1 %462  ;;  %v767_v7 = vrot.slane %v693_v28, %v2181_v0  ;;  %v1509_v28 = vpop.eup %1508  ;;  %v696_v54 = vmul.f32 %v1507_v32, %v2147_v9  ;;  %v2217_v56 = vsub.s32 %v789_v6, %v1957_v13  ;;  %v2228_v9 = vsub.s32 %v810_v60, %v1957_v13 }
 0x1c6   :  { %v779_v59 = vrot.slane %v695_v61, %v2191_v31  ;;  %v2222_v61 = vsub.s32 %v796_v12, %v1957_v13  ;;  %v2225_v20 = vsub.s32 %v803_v52, %v1957_v13  ;;  %v1511_v11 = vpop.eup %1510  ;;  %v697_v51 = vmul.f32 %v1509_v28, %v2152_v37 }
 0x1c7   :  { %v774_v33 = vsel %vm773_vm4, %v772_v50, %v767_v7  ;;  %2532 = vst [vmem:[#allocation23_spill] sm:$0xff] %v2217_v56  ;;  %v642_v50 = vmax.f32 %v610_v29, 1e-16  ;;  %v2233_v32 = vsub.s32 %v817_v22, %v1957_v13  ;;  %1524 = vrsqrt.f32 %v641_v48  ;;  %v1513_v30 = vpop.eup %1512 }
 0x1c8   :  { %v2163_v24 = vpop.xlane.xlu0 %432  ;;  %v781_v7 = vsel %vm780_vm5, %v779_v59, %v774_v33  ;;  %v786_v52 = vrot.slane %v696_v54, %v2209_v45  ;;  %v698_v23 = vmul.f32 %v1511_v11, %v2157_v19  ;;  %v643_v60 = vmax.f32 %v611_v62, 1e-16  ;;  %v1515_v59 = vpop.eup %1514 }
 0x1c9   :  { %v2184_v21 = vpop.xlane.xlu1 %464  ;;  %v612_v29 = vmul.f32 %v2139_v27, %v2132_v17  ;;  %v699_v37 = vmul.f32 %v1513_v30, %v2163_v24  ;;  %v2243_v22 = vsub.s32 %v824_v49, %v1957_v13  ;;  %v2246_v28 = vsub.s32 %v831_v44, %v1957_v13  ;;  %v1517_v33 = vpop.eup %1516 }
 0x1ca   :  { %v838_v48 = vadd.s32 4294967208, %v2161_v36  ;;  %v788_v19 = vsel %vm787_vm6, %v786_v52, %v781_v7  ;;  %v845_v54 = vadd.s32 4294967200, %v2161_v36  ;;  %v852_v17 = vadd.s32 4294967192, %v2161_v36  ;;  %v1519_v27 = vpop.eup %1518 }
 0x1cb   :  { %1526 = vrsqrt.f32 %v642_v50  ;;  %v793_v30 = vrot.slane %v697_v51, %v2217_v56  ;;  %v859_v49 = vadd.s32 4294967184, %v2161_v36  ;;  %v866_v44 = vadd.s32 4294967176, %v2161_v36  ;;  %v1521_v11 = vpop.eup %1520 }
 0x1cc   :  { %v2171_v58 = vpop.xlane.xlu0 %434  ;;  %1528 = vrsqrt.f32 %v643_v60  ;;  %v644_v52 = vmax.f32 %v612_v29, 1e-16  ;;  %v807_v50 = vrot.slane %v699_v37, %v2225_v20  ;;  %v2264_v36 = vsub.s32 %v838_v48, %v1957_v13 }
 0x1cd   :  { %v2201_v38 = vpop.xlane.xlu1 %466  ;;  %v700_v24 = vmul.f32 %v1515_v59, %v2171_v58  ;;  %v1523_v59 = vpop.eup %1522  ;;  %v2271_v37 = vsub.s32 %v852_v17, %v1957_v13 }
 0x1ce   :  { %2531 = vst [vmem:[#allocation22_spill] sm:$0xff] %v2201_v38  ;;  %v795_v38 = vsel %vm794_vm7, %v793_v30, %v788_v19  ;;  %v2282_v19 = vsub.s32 %v866_v44, %v1957_v13  ;;  %1530 = vrsqrt.f32 %v644_v52 }
 0x1d0   :  { %v2186_v16 = vpop.xlane.xlu0 %436 }
 0x1d1   :  { %v2235_v6 = vpop.xlane.xlu1 %468  ;;  %v701_v7 = vmul.f32 %v1517_v33, %v2186_v16  ;;  %v814_v16 = vrot.slane %v700_v24, %v2228_v9 }
 0x1d2   :  { %2533 = vst [vmem:[#allocation24_spill] sm:$0xff] %v2235_v6  ;;  %v800_v6 = vrot.slane %v698_v23, %v2222_v61  ;;  %v2267_v23 = vsub.s32 %v845_v54, %v1957_v13  ;;  %v1525_v54 = vpop.eup %1524 }
 0x1d3   :  { %v821_v48 = vrot.slane %v701_v7, %v2233_v32 }
 0x1d4   :  { %v2193_v46 = vpop.xlane.xlu0 %438 }
 0x1d5   :  { %v702_v51 = vmul.f32 %v1519_v27, %v2193_v46  ;;  %v2261_v56 = vpop.xlane.xlu1 %470  ;;  %v2274_v46 = vsub.s32 %v859_v49, %v1957_v13  ;;  %v1527_v52 = vpop.eup %1526 }
 0x1d7   :  { %v828_v27 = vrot.slane %v702_v51, %v2243_v22 }
 0x1d8   :  { %v441_v35 = vpop.xlane.xlu0 %440 }
 0x1d9   :  { %v703_v58 = vmul.f32 %v1521_v11, %v441_v35  ;;  %v802_v35 = vsel %vm801_vm8, %v800_v6, %v795_v38  ;;  %v2294_v44 = vpop.xlane.xlu1 %472 }
 0x1db   :  { %v835_v17 = vrot.slane %v703_v58, %v2246_v28 }
 0x1dc   :  { %v443_v12 = vpop.xlane.xlu0 %442 }
 0x1dd   :  { %v704_v60 = vmul.f32 %v1523_v59, %v443_v12  ;;  %v809_v12 = vsel %vm808_vm9, %v807_v50, %v802_v35 }
 0x1de   :  { %v816_v49 = vsel %vm815_vm10, %v814_v16, %v809_v12 }
 0x1df   :  { %v842_v11 = vrot.slane %v704_v60, %v2264_v36  ;;  %v823_v50 = vsel %vm822_vm11, %v821_v48, %v816_v49 }
 0x1e0   :  { %v445_v62 = vpop.xlane.xlu0 %444  ;;  %v830_v58 = vsel %vm829_vm12, %v828_v27, %v823_v50 }
 0x1e1   :  { %v705_v30 = vmul.f32 %v1525_v54, %v445_v62 }
 0x1e4   :  { %v588_v29 = vpop.xlane.xlu0 %587 }
 0x1e5   :  { %v2279_v33 = vrot.slane %v588_v29, %v1960_v18  ;;  %v849_v29 = vrot.slane %v705_v30, %v2267_v23 }
 0x1e7   :  { %v626_v38 = vmul.f32 %v2279_v33, %v2126_v2  ;;  %v627_v6 = vmul.f32 %v2279_v33, %v2130_v8  ;;  %v613_v24 = vmul.f32 %v2279_v33, %v2078_v4  ;;  %v614_v62 = vmul.f32 %v2279_v33, %v2080_v10  ;;  %v1529_v10 = vpop.eup %1528 }
 0x1e8   :  { %v447_v7 = vpop.xlane.xlu0 %446  ;;  %v615_v2 = vmul.f32 %v2279_v33, %v2088_v26  ;;  %v616_v4 = vmul.f32 %v2279_v33, %v2095_v34  ;;  %v617_v16 = vmul.f32 %v2279_v33, %v2099_v41  ;;  %v837_v26 = vsel %vm836_vm13, %v835_v17, %v830_v58 }
 0x1e9   :  { %v658_v8 = vmax.f32 %v626_v38, 1e-16  ;;  %v659_v51 = vmax.f32 %v627_v6, 1e-16  ;;  %v706_v59 = vmul.f32 %v1527_v52, %v447_v7  ;;  %v645_v60 = vmax.f32 %v613_v24, 1e-16  ;;  %v2316_v6 = vpop.xlane.xlu1 %474  ;;  %v1531_v7 = vpop.eup %1530 }
 0x1ea   :  { %v618_v35 = vmul.f32 %v2279_v33, %v2101_v25  ;;  %v646_v48 = vmax.f32 %v614_v62, 1e-16  ;;  %v844_v34 = vsel %vm843_vm14, %v842_v11, %v837_v26  ;;  %v619_v12 = vmul.f32 %v2279_v33, %v2103_v39 }
 0x1eb   :  { %1532 = vrsqrt.f32 %v658_v8  ;;  %v647_v27 = vmax.f32 %v615_v2, 1e-16  ;;  %v620_v38 = vmul.f32 %v2279_v33, %v2106_v43  ;;  %v648_v17 = vmax.f32 %v616_v4, 1e-16 }
 0x1ec   :  { %v449_v54 = vpop.xlane.xlu0 %448  ;;  %1534 = vrsqrt.f32 %v659_v51  ;;  %v856_v30 = vrot.slane %v706_v59, %v2271_v37  ;;  %v628_v25 = vmul.f32 %v2279_v33, %v2134_v14  ;;  %v649_v24 = vmax.f32 %v617_v16, 1e-16 }
 0x1ed   :  { %v707_v41 = vmul.f32 %v1529_v10, %v449_v54  ;;  %1536 = vrsqrt.f32 %v645_v60  ;;  %v851_v49 = vsel %vm850_vm15, %v849_v29, %v844_v34  ;;  %v650_v11 = vmax.f32 %v618_v35, 1e-16  ;;  %v2335_v16 = vpop.xlane.xlu1 %476 }
 0x1ee   :  { %1538 = vrsqrt.f32 %v646_v48  ;;  %v621_v39 = vmul.f32 %v2279_v33, %v2112_v42  ;;  %v651_v2 = vmax.f32 %v619_v12, 1e-16  ;;  %v622_v52 = vmul.f32 %v2279_v33, %v2114_v57 }
 0x1ef   :  { %v863_v43 = vrot.slane %v707_v41, %v2274_v46  ;;  %1540 = vrsqrt.f32 %v647_v27  ;;  %v652_v14 = vmax.f32 %v620_v38, 1e-16  ;;  %v623_v8 = vmul.f32 %v2279_v33, %v2116_v63 }
 0x1f0   :  { %v451_v62 = vpop.xlane.xlu0 %450  ;;  %1542 = vrsqrt.f32 %v648_v17  ;;  %v858_v51 = vsel %vm857_vm0, %v856_v30, %v851_v49  ;;  %v660_v4 = vmax.f32 %v628_v25, 1e-16  ;;  %v624_v42 = vmul.f32 %v2279_v33, %v2118_v55 }
 0x1f1   :  { %v708_v50 = vmul.f32 %v1531_v7, %v451_v62  ;;  %1544 = vrsqrt.f32 %v649_v24  ;;  %v625_v59 = vmul.f32 %v2279_v33, %v2122_v5  ;;  %v653_v57 = vmax.f32 %v621_v39, 1e-16  ;;  %v479_v27 = vpop.xlane.xlu1 %478 }
 0x1f2   :  { %1546 = vrsqrt.f32 %v650_v11  ;;  %v654_v60 = vmax.f32 %v622_v52, 1e-16  ;;  %v865_v63 = vsel %vm864_vm1, %v863_v43, %v858_v51  ;;  %v655_v10 = vmax.f32 %v623_v8, 1e-16  ;;  %v2534_v52 = vld [vmem:[#allocation23_spill] sm:$0xff]  ;;  %v2535_v8 = vld [vmem:[#allocation22_spill] sm:$0xff] }
 0x1f3   :  { %v870_v58 = vrot.slane %v708_v50, %v2282_v19  ;;  %1548 = vrsqrt.f32 %v651_v2  ;;  %v656_v35 = vmax.f32 %v624_v42, 1e-16  ;;  %v657_v34 = vmax.f32 %v625_v59, 1e-16  ;;  %v2536_v59 = vld [vmem:[#allocation24_spill] sm:$0xff] }
 0x1f4   :  { %1550 = vrsqrt.f32 %v652_v14  ;;  %v453_v55 = vpop.xlane.xlu0 %452 }
 0x1f5   :  { %v2339_v26 = vsel %vm871_vm2, %v870_v58, %v865_v63  ;;  %v1533_v29 = vpop.eup %1532  ;;  %1552 = vrsqrt.f32 %v660_v4  ;;  %v481_v14 = vpop.xlane.xlu1 %480 }
 0x1f6   :  { %v1535_v48 = vpop.eup %1534  ;;  %1554 = vrsqrt.f32 %v653_v57 }
 0x1f7   :  { %v1537_v5 = vpop.eup %1536  ;;  %1556 = vrsqrt.f32 %v654_v60 }
 0x1f8   :  { %v1539_v33 = vpop.eup %1538  ;;  %v709_v54 = vmul.f32 %v1537_v5, %v453_v55  ;;  %1558 = vrsqrt.f32 %v655_v10  ;;  %v722_v5 = vmul.f32 %v1533_v29, %v479_v27 }
 0x1f9   :  { %v1541_v12 = vpop.eup %1540  ;;  %v710_v41 = vmul.f32 %v1539_v33, %v2136_v1  ;;  %1560 = vrsqrt.f32 %v656_v35 }
 0x1fa   :  { %v1543_v38 = vpop.eup %1542  ;;  %v711_v17 = vmul.f32 %v1541_v12, %v2141_v40  ;;  %v876_v30 = vrot.slane %v709_v54, %v2181_v0  ;;  %1562 = vrsqrt.f32 %v657_v34  ;;  %v723_v54 = vmul.f32 %v1535_v48, %v481_v14  ;;  %v483_v12 = vpop.xlane.xlu1 %482 }
 0x1fb   :  { %v1545_v25 = vpop.eup %1544  ;;  %v712_v24 = vmul.f32 %v1543_v38, %v2149_v53  ;;  %v880_v49 = vrot.slane %v710_v41, %v2177_v3 }
 0x1fc   :  { %v1547_v11 = vpop.eup %1546  ;;  %v713_v39 = vmul.f32 %v1545_v25, %v2155_v15  ;;  %v885_v7 = vrot.slane %v711_v17, %v2191_v31  ;;  %v945_v48 = vrot.slane %v723_v54, %v2274_v46 }
 0x1fd   :  { %v1549_v43 = vpop.eup %1548  ;;  %v714_v1 = vmul.f32 %v1547_v11, %v2166_v47  ;;  %v890_v62 = vrot.slane %v712_v24, %v2209_v45  ;;  %v881_v40 = vsel %vm773_vm4, %v880_v49, %v876_v30  ;;  %v728_v49 = vpop.permute.xlu0 %727  ;;  %vm956_vm4 = vcmask 1041408   ;;  %v2537_v11 = vld [vmem:[#allocation20_spill] sm:$0xff] }
 0x1fe   :  { %v1551_v2 = vpop.eup %1550  ;;  %v715_v0 = vmul.f32 %v1549_v43, %v2184_v21  ;;  %v895_v50 = vrot.slane %v713_v39, %v2534_v52  ;;  %v886_v53 = vsel %vm780_vm5, %v885_v7, %v881_v40  ;;  %v1743_v43 = vmov 1  }
 0x1ff   :  { %v1553_v3 = vpop.eup %1552  ;;  %v716_v15 = vmul.f32 %v1551_v2, %v2535_v8  ;;  %v900_v31 = vrot.slane %v714_v1, %v2222_v61  ;;  %v891_v51 = vsel %vm787_vm6, %v890_v62, %v886_v53  ;;  %1485 = vset.pattern.permute.xlu1 %v1743_v43  ;;  %1486 = vset.pattern.permute.xlu0 %v1743_v43  ;;  %v294_v1 = vsub.f32 0.0, %v2537_v11 }
 0x200   :  { %v1555_v47 = vpop.eup %1554  ;;  %v905_v45 = vrot.slane %v715_v0, %v2225_v20  ;;  %v896_v4 = vsel %vm794_vm7, %v895_v50, %v891_v51  ;;  %v724_v17 = vmul.f32 %v1553_v3, %v483_v12  ;;  %vm310_vm5 = vcmask 17408  }
 0x201   :  { %v1557_v42 = vpop.eup %1556  ;;  %v910_v21 = vrot.slane %v716_v15, %v2228_v9  ;;  %v901_v58 = vsel %vm801_vm8, %v900_v31, %v896_v4  ;;  %v717_v57 = vmul.f32 %v1555_v47, %v2536_v59  ;;  %v295_v62 = vmul.f32 1.442695, %v294_v1  ;;  %v64_v59 = vld [vmem:[%s2509_s1] sm:$0x3]  ;;  %s1750_s1 = smov [#allocation8]  }
 0x202   :  { %v1559_v60 = vpop.eup %1558  ;;  %v906_v63 = vsel %vm808_vm9, %v905_v45, %v901_v58  ;;  %v718_v10 = vmul.f32 %v1557_v42, %v2261_v56  ;;  %v950_v27 = vrot.slane %v724_v17, %v2282_v19  ;;  %v1744_v15 = vmov 2   ;;  %s1420_s18 = sshll.u32 %s1750_s1, 4  ;;  %s1421_s18 = int_to_ptr.vmem [resolvable:$true] %s1420_s18 }
 0x203   :  { %v1561_v61 = vpop.eup %1560  ;;  %v911_v55 = vsel %vm815_vm10, %v910_v21, %v906_v63  ;;  %v719_v35 = vmul.f32 %v1559_v60, %v2294_v44  ;;  %v915_v20 = vrot.slane %v717_v57, %v2233_v32  ;;  %v1745_v51 = vmov 5   ;;  %s1680_s19 = scalar_lea.vmem %s1421_s18, 32  ;;  %p1685_p11 = scmp.lt.s32.totalorder %s1421_s18, %s1421_s18 }
 0x204   :  { %v1563_v34 = vpop.eup %1562  ;;  %v720_v9 = vmul.f32 %v1561_v61, %v2316_v6  ;;  %v920_v33 = vrot.slane %v718_v10, %v2243_v22  ;;  %v940_v6 = vrot.slane %v722_v5, %v2271_v37  ;;  %v1746_v21 = vmov 3   ;;  %p1681_p10 = scmp.ne.s32.totalorder %s1421_s18, %s1680_s19  ;;  %p1686_p12 = scmp.lt.s32.totalorder %s1680_s19, %s1680_s19 }
 0x205   :  { %v721_v41 = vmul.f32 %v1563_v34, %v2335_v16  ;;  %v916_v38 = vsel %vm822_vm11, %v915_v20, %v911_v55  ;;  %v925_v56 = vrot.slane %v719_v35, %v2246_v28  ;;  %v1747_v63 = vmov 4   ;;  %v2538_v20 = vld [vmem:[#allocation21_spill] sm:$0xff] }
 0x206   :  { %v921_v30 = vsel %vm829_vm12, %v920_v33, %v916_v38  ;;  %v930_v44 = vrot.slane %v720_v9, %v2264_v36  ;;  %v302_v36 = vpop.xlane.xlu1 %301  ;;  %v316_v34 = vadd.f32 1.0, %v2538_v20  ;;  %p1687_p13 = por %p1686_p12, %p1685_p11 }
 0x207   :  { %v926_v32 = vsel %vm836_vm13, %v925_v56, %v921_v30  ;;  %v935_v29 = vrot.slane %v721_v41, %v2267_v23  ;;  %v303_v39 = vsub.f32 %v2537_v11, %v302_v36 }
 0x208   :  { %v931_v22 = vsel %vm843_vm14, %v930_v44, %v926_v32  ;;  %p1688_p0 = pnand %p1687_p13, %p1681_p10 }
 0x209   :  { %v936_v16 = vsel %vm850_vm15, %v935_v29, %v931_v22  ;;  %v304_v7 = vmul.f32 1.442695, %v303_v39 }
 0x20a   :  { %v941_v28 = vsel %vm857_vm0, %v940_v6, %v936_v16 }
 0x20b   :  { %v946_v25 = vsel %vm864_vm1, %v945_v48, %v941_v28  ;;  %1564 = vpow2.f32 %v304_v7 }
 0x20c   :  { %v951_v24 = vsel %vm871_vm2, %v950_v27, %v946_v25  ;;  %1566 = vpow2.f32 %v295_v62 }
 0x20d   :  { %v953_v23 = vsel %vm952_vm3, %v951_v24, %v2339_v26 }
 0x20e   :  { %v955_v37 = vmul.f32 %v953_v23, %v728_v49  ;;  %v2539_v49 = vsub.s32 1, %v1957_v13 }
 0x210   :  { %v957_v46 = vsel %vm956_vm4, %v955_v37, -inf }
 0x211   :  { %958 = vmax.xlane.f32.xlu1 %v957_v46 }
 0x215   :  { %v1565_v19 = vpop.eup %1564 }
 0x216   :  { %v1567_v52 = vpop.eup %1566 }
 0x217   :  { %v297_v53 = vadd.f32 1.0, %v1567_v52 }
 0x222   :  { %307 = vrot.lane.b32.xlu1 %v1565_v19, %s1742_s4 }
 0x29e   :  { %v959_v26 = vpop.xlane.xlu1 %958 }
 0x29f   :  { %v960_v40 = vsub.f32 %v955_v37, %v959_v26 }
 0x2a1   :  { %v961_v2 = vmul.f32 1.442695, %v960_v40 }
 0x2a2   :  { %v308_v0 = vpop.permute.xlu1 %307 }
 0x2a3   :  { %1568 = vpow2.f32 %v961_v2  ;;  %v311_v50 = vsel %vm310_vm5, %v308_v0, 0.0 }
 0x2a4   :  { %312 = vadd.xlane.f32.xlu1 %v311_v50  ;;  %1570 = vrcp.f32 %v297_v53 }
 0x2ad   :  { %v1569_v3 = vpop.eup %1568 }
 0x2ae   :  { %v963_v14 = vsel %vm956_vm4, %v1569_v3, 0.0  ;;  %v1571_v8 = vpop.eup %1570 }
 0x2af   :  { %964 = vadd.xlane.f32.xlu0 %v963_v14  ;;  %v974_v31 = vsub.f32 1.0, %v1571_v8 }
 0x2b5   :  { %970 = vperm.xlu1 %1485, %v1571_v8  }
 0x2b9   :  { %1487 = vset.pattern.permute.xlu1 %v1744_v15 }
 0x2c5   :  { %977 = vperm.xlu0 %1486, %v974_v31  }
 0x2c9   :  { %1491 = vset.pattern.permute.xlu0 %v1745_v51 }
 0x331   :  { %v313_v47 = vpop.xlane.xlu1 %312 }
 0x332   :  { %1572 = vrcp.f32 %v313_v47 }
 0x335   :  { %v971_v10 = vpop.permute.xlu1 %970 }
 0x33c   :  { %v1573_v45 = vpop.eup %1572  ;;  %v965_v4 = vpop.xlane.xlu0 %964 }
 0x33d   :  { %1574 = vrcp.f32 %v965_v4  ;;  %v315_v42 = vmul.f32 %v1573_v45, %v1565_v19 }
 0x33f   :  { %988 = vperm.xlu1 %1487, %v315_v42  }
 0x343   :  { %1488 = vset.pattern.permute.xlu1 %v1746_v21 }
 0x344   :  { %993 = vperm.xlu1 %1488, %v315_v42   ;;  %v978_v57 = vpop.permute.xlu0 %977 }
 0x345   :  { %v980_v55 = vmul.f32 %v978_v57, %v64_v59 }
 0x347   :  { %v1575_v58 = vpop.eup %1574 }
 0x348   :  { %v967_v60 = vmul.f32 %v1575_v58, %v1569_v3  ;;  %1489 = vset.pattern.permute.xlu1 %v1747_v63 }
 0x349   :  { %999 = vperm.xlu1 %1489, %v315_v42  }
 0x34a   :  { %v973_v61 = vmul.f32 %v971_v10, %v967_v60 }
 0x34c   :  { %v981_v35 = vadd.f32 %v980_v55, %v973_v61 }
 0x34d   :  { %1490 = vset.pattern.permute.xlu1 %v1745_v51 }
 0x34e   :  { %982 = vrot.lane.b32.xlu1 %v981_v35, %s1748_s16 }
 0x352   :  { %984 = vrot.lane.b32.xlu1 %v981_v35, %s1749_s17 }
 0x356   :  { %1009 = vperm.xlu1 %1490, %v316_v34  }
 0x3be   :  { %v989_v5 = vpop.permute.xlu1 %988 }
 0x3c3   :  { %v994_v9 = vpop.permute.xlu1 %993 }
 0x3c4   :  { %v996_v41 = vmul.f32 %v994_v9, %v981_v35 }
 0x3c8   :  { %v1000_v33 = vpop.permute.xlu1 %999 }
 0x3cc   :  { %v983_v54 = vpop.permute.xlu1 %982 }
 0x3cd   :  { %v991_v12 = vmul.f32 %v989_v5, %v983_v54 }
 0x3cf   :  { %v997_v56 = vadd.f32 %v996_v41, %v991_v12 }
 0x3d0   :  { %v985_v38 = vpop.permute.xlu1 %984 }
 0x3d1   :  { %v1002_v17 = vmul.f32 %v1000_v33, %v985_v38 }
 0x3d3   :  { %v1003_v30 = vadd.f32 %v1002_v17, %v997_v56 }
 0x3d5   :  { %v1004_v44 = vmax.f32 %v1003_v30, 1e-16  ;;  %v1010_v6 = vpop.permute.xlu1 %1009 }
 0x3d7   :  { %1576 = vlog2.f32 %v1004_v44 }
 0x3e1   :  { %v1577_v32 = vpop.eup %1576 }
 0x3e2   :  { %v1006_v29 = vmul.f32 0.6931472, %v1577_v32 }
 0x3e4   :  { %v1012_v22 = vmul.f32 %v1010_v6, %v1006_v29 }
 0x3e6   :  { %v1013_v48 = vmul.f32 1.442695, %v1012_v22 }
 0x3e8   :  { %1578 = vpow2.f32 %v1013_v48 }
 0x3f2   :  { %v1579_v16 = vpop.eup %1578 }
 0x3f3   :  { %v1015_v27 = vsel %vm956_vm4, %v1579_v16, 0.0 }
 0x3f4   :  { %1016 = vadd.xlane.f32.xlu1 %v1015_v27 }
 0x481   :  { %v1017_v28 = vpop.xlane.xlu1 %1016 }
 0x482   :  { %v1018_v25 = vadd.f32 1e-16, %v1017_v28 }
 0x484   :  { %1580 = vrcp.f32 %v1018_v25 }
 0x48e   :  { %v1581_v36 = vpop.eup %1580 }
 0x48f   :  { %v1020_v24 = vmul.f32 %v1581_v36, %v1579_v16 }
 0x491   :  { %v1024_v23 = vrot.slane %v1020_v24, %v1960_v18  ;;  %1285 = vst [vmem:[#allocation8] sm:$0x3] %v1020_v24  ;;  %v1091_v37 = vrot.slane %v1020_v24, %v2539_v49 }
 0x493   :  { %1046 = vbcast.lane.b32.xlu1 %v1024_v23, 296  ;;  %1026 = vbcast.lane.b32.xlu0 %v1024_v23, 256 }
 0x497   :  { %1070 = vbcast.lane.b32.xlu1 %v1024_v23, 344  ;;  %1030 = vbcast.lane.b32.xlu0 %v1024_v23, 264 }
 0x49b   :  { %1078 = vbcast.lane.b32.xlu1 %v1024_v23, 360  ;;  %1034 = vbcast.lane.b32.xlu0 %v1024_v23, 272 }
 0x49f   :  { %1086 = vbcast.lane.b32.xlu1 %v1024_v23, 376  ;;  %1038 = vbcast.lane.b32.xlu0 %v1024_v23, 280 }
 0x4a3   :  { %1097 = vbcast.lane.b32.xlu1 %v1091_v37, 264  ;;  %1042 = vbcast.lane.b32.xlu0 %v1024_v23, 288 }
 0x4a7   :  { %1105 = vbcast.lane.b32.xlu1 %v1091_v37, 280  ;;  %1050 = vbcast.lane.b32.xlu0 %v1024_v23, 304 }
 0x4ab   :  { %1113 = vbcast.lane.b32.xlu1 %v1091_v37, 296  ;;  %1054 = vbcast.lane.b32.xlu0 %v1024_v23, 312 }
 0x4af   :  { %1121 = vbcast.lane.b32.xlu1 %v1091_v37, 312  ;;  %1058 = vbcast.lane.b32.xlu0 %v1024_v23, 320 }
 0x4b3   :  { %1129 = vbcast.lane.b32.xlu1 %v1091_v37, 328  ;;  %1062 = vbcast.lane.b32.xlu0 %v1024_v23, 328 }
 0x4b7   :  { %1137 = vbcast.lane.b32.xlu1 %v1091_v37, 344  ;;  %1066 = vbcast.lane.b32.xlu0 %v1024_v23, 336 }
 0x4bb   :  { %1145 = vbcast.lane.b32.xlu1 %v1091_v37, 360  ;;  %1074 = vbcast.lane.b32.xlu0 %v1024_v23, 352 }
 0x4bf   :  { %1153 = vbcast.lane.b32.xlu1 %v1091_v37, 376  ;;  %1082 = vbcast.lane.b32.xlu0 %v1024_v23, 368 }
 0x4c3   :  { %1093 = vbcast.lane.b32.xlu0 %v1091_v37, 256 }
 0x4c7   :  { %1101 = vbcast.lane.b32.xlu0 %v1091_v37, 272 }
 0x4cb   :  { %1109 = vbcast.lane.b32.xlu0 %v1091_v37, 288 }
 0x4cf   :  { %1117 = vbcast.lane.b32.xlu0 %v1091_v37, 304 }
 0x4d3   :  { %1125 = vbcast.lane.b32.xlu0 %v1091_v37, 320 }
 0x4d7   :  { %1133 = vbcast.lane.b32.xlu0 %v1091_v37, 336 }
 0x4db   :  { %1141 = vbcast.lane.b32.xlu0 %v1091_v37, 352 }
 0x4dc   :  { %1691 = shalt.err (!%p1688_p0)
}
 0x4dd   :  { %s1692_s2 = scalar_lea.hbm %s2513_s5, 32 }
 0x4de   :  { %p1693_p1 = scmp.ne.s32.totalorder %s2513_s5, %s1692_s2  ;;  %p1696_p2 = scmp.lt.u32.totalorder %s1692_s2, %s2513_s5 }
 0x4e0   :  { %p1698_p3 = pnand %p1696_p2, %p1693_p1 }
 0x4e2   :  { %1701 = shalt.err (!%p1698_p3)
}
 0x4e3   :  { %1423 = dma.vmem_to_hbm [thread:$0]  %s1421_s18, 32, %s2513_s5, [#allocation4]   ;;  %1149 = vbcast.lane.b32.xlu0 %v1091_v37, 368  ;;  %v2540_v13 = vld [vmem:[#allocation18_spill] sm:$0xff]  ;;  %v2541_v11 = vld [vmem:[#allocation15_spill] sm:$0xff]  ;;  %v2543_v62 = vld [vmem:[#allocation16_spill] sm:$0xff] }
 0x4e4   :  { %v2542_v39 = vrot.slane %v2540_v13, %v2541_v11  ;;  %v2544_v26 = vrot.slane %v2543_v62, %v2541_v11  ;;  %v1582_v3 = vld [vmem:[#allocation5 + $0x28] sm:$0xff]  ;;  %v1583_v15 = vld [vmem:[#allocation5] sm:$0xff]  ;;  %v1584_v60 = vld [vmem:[#allocation5 + $0x58] sm:$0xff]  ;;  %s1751_s5 = smov [#allocation9]  }
 0x4e5   :  { %v1585_v35 = vld [vmem:[#allocation5 + $0x8] sm:$0xff]  ;;  %v1587_v30 = vld [vmem:[#allocation5 + $0x10] sm:$0xff]  ;;  %v1588_v23 = vld [vmem:[#allocation5 + $0x78] sm:$0xff]  ;;  %s1429_s28 = sshll.u32 %s1751_s5, 4  ;;  %s1430_s28 = int_to_ptr.vmem [resolvable:$true] %s1429_s28 }
 0x4e6   :  { %v2413_v46 = vrot.slane %v2542_v39, %v1960_v18  ;;  %v2421_v40 = vrot.slane %v2544_v26, %v1960_v18  ;;  %v1586_v38 = vld [vmem:[#allocation5 + $0x68] sm:$0xff]  ;;  %v2546_v11 = vld [vmem:[#allocation17_spill] sm:$0xff]  ;;  %s1702_s29 = scalar_lea.vmem %s1430_s28, 4096  ;;  %p1707_p5 = scmp.lt.s32.totalorder %s1430_s28, %s1430_s28 }
 0x4e7   :  { %v2545_v6 = vld [vmem:[#allocation19_spill] sm:$0xff]  ;;  %v2444_v39 = vrot.slane %v2546_v11, %v1960_v18  ;;  %p1703_p4 = scmp.ne.s32.totalorder %s1430_s28, %s1702_s29  ;;  %p1708_p6 = scmp.lt.s32.totalorder %s1702_s29, %s1702_s29 }
 0x4e8   :  { %v2437_v22 = vrot.slane %v2545_v6, %v1960_v18 }
 0x4e9   :  { %p1709_p7 = por %p1708_p6, %p1707_p5 }
 0x4eb   :  { %p1710_p8 = pnand %p1709_p7, %p1703_p4 }
 0x505   :  { %v1047_v7 = vpop.permute.xlu1 %1046  ;;  %v1027_v19 = vpop.permute.xlu0 %1026 }
 0x506   :  { %v1193_v43 = vmul.f32 %v2413_v46, %v1047_v7  ;;  %v1188_v1 = vmul.f32 %v2413_v46, %v1027_v19  ;;  %v1258_v52 = vmul.f32 %v2421_v40, %v1047_v7  ;;  %v1253_v8 = vmul.f32 %v2421_v40, %v1027_v19  ;;  %v1589_v19 = vld [vmem:[#allocation5 + $0x18] sm:$0xff] }
 0x508   :  { %v1291_v2 = vsub.f32 1.0, %v1193_v43  ;;  %v1286_v0 = vsub.f32 1.0, %v1188_v1 }
 0x509   :  { %v1071_v50 = vpop.permute.xlu1 %1070  ;;  %v1031_v53 = vpop.permute.xlu0 %1030 }
 0x50a   :  { %v1323_v14 = vmul.f32 %v1582_v3, %v1291_v2  ;;  %v1318_v31 = vmul.f32 %v1583_v15, %v1286_v0  ;;  %v1199_v51 = vmul.f32 %v2413_v46, %v1071_v50  ;;  %v1189_v47 = vmul.f32 %v2413_v46, %v1031_v53 }
 0x50b   :  { %v1264_v57 = vmul.f32 %v2421_v40, %v1071_v50  ;;  %v1254_v55 = vmul.f32 %v2421_v40, %v1031_v53  ;;  %v1590_v53 = vld [vmem:[#allocation5 + $0x88] sm:$0xff] }
 0x50c   :  { %v1355_v45 = vadd.f32 %v1323_v14, %v1258_v52  ;;  %v1350_v4 = vadd.f32 %v1318_v31, %v1253_v8  ;;  %v1297_v42 = vsub.f32 1.0, %v1199_v51  ;;  %v1287_v21 = vsub.f32 1.0, %v1189_v47  ;;  %v1591_v8 = vld [vmem:[#allocation5 + $0x20] sm:$0xff] }
 0x50d   :  { %v1079_v58 = vpop.permute.xlu1 %1078  ;;  %v1035_v59 = vpop.permute.xlu0 %1034 }
 0x50e   :  { %1387 = vst [vmem:[#allocation9 + $0x28] sm:$0xff] %v1355_v45  ;;  %1382 = vst [vmem:[#allocation9] sm:$0xff] %v1350_v4  ;;  %v1329_v63 = vmul.f32 %v1584_v60, %v1297_v42  ;;  %v1201_v10 = vmul.f32 %v2413_v46, %v1079_v58  ;;  %v1190_v61 = vmul.f32 %v2413_v46, %v1035_v59 }
 0x50f   :  { %v1319_v20 = vmul.f32 %v1585_v35, %v1287_v21  ;;  %v1266_v54 = vmul.f32 %v2421_v40, %v1079_v58  ;;  %v1255_v17 = vmul.f32 %v2421_v40, %v1035_v59  ;;  %v1592_v59 = vld [vmem:[#allocation5 + $0x98] sm:$0xff] }
 0x510   :  { %v1361_v34 = vadd.f32 %v1329_v63, %v1264_v57  ;;  %v1299_v5 = vsub.f32 1.0, %v1201_v10  ;;  %v1288_v9 = vsub.f32 1.0, %v1190_v61  ;;  %v1593_v61 = vld [vmem:[#allocation5 + $0x30] sm:$0xff] }
 0x511   :  { %v1351_v33 = vadd.f32 %v1319_v20, %v1254_v55  ;;  %v1087_v12 = vpop.permute.xlu1 %1086  ;;  %v1039_v41 = vpop.permute.xlu0 %1038 }
 0x512   :  { %1393 = vst [vmem:[#allocation9 + $0x58] sm:$0xff] %v1361_v34  ;;  %v1331_v56 = vmul.f32 %v1586_v38, %v1299_v5  ;;  %v1320_v44 = vmul.f32 %v1587_v30, %v1288_v9  ;;  %v1203_v32 = vmul.f32 %v2413_v46, %v1087_v12  ;;  %v1191_v29 = vmul.f32 %v2413_v46, %v1039_v41 }
 0x513   :  { %1383 = vst [vmem:[#allocation9 + $0x8] sm:$0xff] %v1351_v33  ;;  %v1268_v24 = vmul.f32 %v2421_v40, %v1087_v12  ;;  %v1256_v7 = vmul.f32 %v2421_v40, %v1039_v41  ;;  %v1594_v12 = vld [vmem:[#allocation5 + $0xa8] sm:$0xff] }
 0x514   :  { %v1363_v48 = vadd.f32 %v1331_v56, %v1266_v54  ;;  %v1352_v16 = vadd.f32 %v1320_v44, %v1255_v17  ;;  %v1301_v27 = vsub.f32 1.0, %v1203_v32  ;;  %v1289_v28 = vsub.f32 1.0, %v1191_v29  ;;  %v1595_v56 = vld [vmem:[#allocation5 + $0x38] sm:$0xff] }
 0x515   :  { %v1098_v25 = vpop.permute.xlu1 %1097  ;;  %v1043_v36 = vpop.permute.xlu0 %1042 }
 0x516   :  { %1395 = vst [vmem:[#allocation9 + $0x68] sm:$0xff] %v1363_v48  ;;  %1384 = vst [vmem:[#allocation9 + $0x10] sm:$0xff] %v1352_v16  ;;  %v1333_v49 = vmul.f32 %v1588_v23, %v1301_v27  ;;  %v1205_v37 = vmul.f32 %v2437_v22, %v1098_v25  ;;  %v1192_v13 = vmul.f32 %v2413_v46, %v1043_v36 }
 0x517   :  { %v1321_v43 = vmul.f32 %v1589_v19, %v1289_v28  ;;  %v1270_v0 = vmul.f32 %v2444_v39, %v1098_v25  ;;  %v1257_v14 = vmul.f32 %v2421_v40, %v1043_v36  ;;  %v1596_v25 = vld [vmem:[#allocation5 + $0xb8] sm:$0xff] }
 0x518   :  { %v1365_v1 = vadd.f32 %v1333_v49, %v1268_v24  ;;  %v1303_v62 = vsub.f32 1.0, %v1205_v37  ;;  %v1290_v26 = vsub.f32 1.0, %v1192_v13  ;;  %v1597_v37 = vld [vmem:[#allocation5 + $0x40] sm:$0xff] }
 0x519   :  { %v1353_v2 = vadd.f32 %v1321_v43, %v1256_v7  ;;  %v1106_v52 = vpop.permute.xlu1 %1105  ;;  %v1051_v50 = vpop.permute.xlu0 %1050 }
 0x51a   :  { %1397 = vst [vmem:[#allocation9 + $0x78] sm:$0xff] %v1365_v1  ;;  %v1335_v3 = vmul.f32 %v1590_v53, %v1303_v62  ;;  %v1322_v18 = vmul.f32 %v1591_v8, %v1290_v26  ;;  %v1207_v15 = vmul.f32 %v2437_v22, %v1106_v52  ;;  %v1194_v31 = vmul.f32 %v2413_v46, %v1051_v50 }
 0x51b   :  { %1385 = vst [vmem:[#allocation9 + $0x18] sm:$0xff] %v1353_v2  ;;  %v1272_v58 = vmul.f32 %v2444_v39, %v1106_v52  ;;  %v1259_v10 = vmul.f32 %v2421_v40, %v1051_v50  ;;  %v1598_v2 = vld [vmem:[#allocation5 + $0xc8] sm:$0xff] }
 0x51c   :  { %v1367_v51 = vadd.f32 %v1335_v3, %v1270_v0  ;;  %v1354_v47 = vadd.f32 %v1322_v18, %v1257_v14  ;;  %v1305_v45 = vsub.f32 1.0, %v1207_v15  ;;  %v1292_v4 = vsub.f32 1.0, %v1194_v31  ;;  %v1599_v50 = vld [vmem:[#allocation5 + $0x48] sm:$0xff] }
 0x51d   :  { %v1114_v42 = vpop.permute.xlu1 %1113  ;;  %v1055_v21 = vpop.permute.xlu0 %1054 }
 0x51e   :  { %1399 = vst [vmem:[#allocation9 + $0x88] sm:$0xff] %v1367_v51  ;;  %1386 = vst [vmem:[#allocation9 + $0x20] sm:$0xff] %v1354_v47  ;;  %v1337_v57 = vmul.f32 %v1592_v59, %v1305_v45  ;;  %v1209_v60 = vmul.f32 %v2437_v22, %v1114_v42  ;;  %v1195_v63 = vmul.f32 %v2413_v46, %v1055_v21 }
 0x51f   :  { %v1324_v55 = vmul.f32 %v1593_v61, %v1292_v4  ;;  %v1274_v9 = vmul.f32 %v2444_v39, %v1114_v42  ;;  %v1260_v38 = vmul.f32 %v2421_v40, %v1055_v21  ;;  %v1600_v4 = vld [vmem:[#allocation5 + $0xd8] sm:$0xff] }
 0x520   :  { %v1369_v35 = vadd.f32 %v1337_v57, %v1272_v58  ;;  %v1307_v20 = vsub.f32 1.0, %v1209_v60  ;;  %v1293_v34 = vsub.f32 1.0, %v1195_v63  ;;  %v1601_v57 = vld [vmem:[#allocation5 + $0x50] sm:$0xff] }
 0x521   :  { %v1356_v5 = vadd.f32 %v1324_v55, %v1259_v10  ;;  %v1122_v33 = vpop.permute.xlu1 %1121  ;;  %v1059_v54 = vpop.permute.xlu0 %1058 }
 0x522   :  { %1401 = vst [vmem:[#allocation9 + $0x98] sm:$0xff] %v1369_v35  ;;  %v1339_v41 = vmul.f32 %v1594_v12, %v1307_v20  ;;  %v1325_v17 = vmul.f32 %v1595_v56, %v1293_v34  ;;  %v1211_v30 = vmul.f32 %v2437_v22, %v1122_v33  ;;  %v1196_v44 = vmul.f32 %v2413_v46, %v1059_v54 }
 0x523   :  { %1388 = vst [vmem:[#allocation9 + $0x30] sm:$0xff] %v1356_v5  ;;  %v1276_v28 = vmul.f32 %v2444_v39, %v1122_v33  ;;  %v1261_v49 = vmul.f32 %v2421_v40, %v1059_v54  ;;  %v1602_v5 = vld [vmem:[#allocation5 + $0xe8] sm:$0xff]  ;;  %v1603_v54 = vld [vmem:[#allocation5 + $0x60] sm:$0xff] }
 0x524   :  { %v1371_v32 = vadd.f32 %v1339_v41, %v1274_v9  ;;  %v1357_v29 = vadd.f32 %v1325_v17, %v1260_v38  ;;  %v1309_v6 = vsub.f32 1.0, %v1211_v30  ;;  %v1294_v48 = vsub.f32 1.0, %v1196_v44 }
 0x525   :  { %v1130_v16 = vpop.permute.xlu1 %1129  ;;  %v1063_v27 = vpop.permute.xlu0 %1062 }
 0x526   :  { %1403 = vst [vmem:[#allocation9 + $0xa8] sm:$0xff] %v1371_v32  ;;  %1389 = vst [vmem:[#allocation9 + $0x38] sm:$0xff] %v1357_v29  ;;  %v1341_v36 = vmul.f32 %v1596_v25, %v1309_v6  ;;  %v1213_v24 = vmul.f32 %v2437_v22, %v1130_v16  ;;  %v1197_v23 = vmul.f32 %v2413_v46, %v1063_v27  ;;  %v1604_v6 = vld [vmem:[#allocation5 + $0xf8] sm:$0xff] }
 0x527   :  { %v1326_v13 = vmul.f32 %v1597_v37, %v1294_v48  ;;  %v1278_v1 = vmul.f32 %v2444_v39, %v1130_v16  ;;  %v1262_v52 = vmul.f32 %v2421_v40, %v1063_v27  ;;  %v1606_v37 = vld [vmem:[#allocation5 + $0x80] sm:$0xff] }
 0x528   :  { %v1373_v11 = vadd.f32 %v1341_v36, %v1276_v28  ;;  %v1311_v7 = vsub.f32 1.0, %v1213_v24  ;;  %v1295_v19 = vsub.f32 1.0, %v1197_v23  ;;  %v1605_v28 = vld [vmem:[#allocation5 + $0x70] sm:$0xff] }
 0x529   :  { %v1358_v43 = vadd.f32 %v1326_v13, %v1261_v49  ;;  %v1138_v62 = vpop.permute.xlu1 %1137  ;;  %v1067_v26 = vpop.permute.xlu0 %1066 }
 0x52a   :  { %1405 = vst [vmem:[#allocation9 + $0xb8] sm:$0xff] %v1373_v11  ;;  %v1343_v0 = vmul.f32 %v1598_v2, %v1311_v7  ;;  %v1327_v53 = vmul.f32 %v1599_v50, %v1295_v19  ;;  %v1215_v3 = vmul.f32 %v2437_v22, %v1138_v62  ;;  %v1198_v14 = vmul.f32 %v2413_v46, %v1067_v26 }
 0x52b   :  { %1390 = vst [vmem:[#allocation9 + $0x40] sm:$0xff] %v1358_v43  ;;  %v1280_v45 = vmul.f32 %v2444_v39, %v1138_v62  ;;  %v1263_v59 = vmul.f32 %v2421_v40, %v1067_v26 }
 0x52c   :  { %v1375_v8 = vadd.f32 %v1343_v0, %v1278_v1  ;;  %v1359_v18 = vadd.f32 %v1327_v53, %v1262_v52  ;;  %v1313_v15 = vsub.f32 1.0, %v1215_v3  ;;  %v1296_v31 = vsub.f32 1.0, %v1198_v14  ;;  %v1607_v1 = vld [vmem:[#allocation5 + $0x90] sm:$0xff]  ;;  %v1608_v53 = vld [vmem:[#allocation5 + $0xa0] sm:$0xff] }
 0x52d   :  { %v1146_v51 = vpop.permute.xlu1 %1145  ;;  %v1075_v47 = vpop.permute.xlu0 %1074 }
 0x52e   :  { %1407 = vst [vmem:[#allocation9 + $0xc8] sm:$0xff] %v1375_v8  ;;  %1391 = vst [vmem:[#allocation9 + $0x48] sm:$0xff] %v1359_v18  ;;  %v1345_v42 = vmul.f32 %v1600_v4, %v1313_v15  ;;  %v1217_v21 = vmul.f32 %v2437_v22, %v1146_v51  ;;  %v1200_v58 = vmul.f32 %v2413_v46, %v1075_v47 }
 0x52f   :  { %v1328_v60 = vmul.f32 %v1601_v57, %v1296_v31  ;;  %v1282_v35 = vmul.f32 %v2444_v39, %v1146_v51  ;;  %v1265_v33 = vmul.f32 %v2421_v40, %v1075_v47  ;;  %v1609_v51 = vld [vmem:[#allocation5 + $0xb0] sm:$0xff] }
 0x530   :  { %v1377_v63 = vadd.f32 %v1345_v42, %v1280_v45  ;;  %v1315_v10 = vsub.f32 1.0, %v1217_v21  ;;  %v1298_v61 = vsub.f32 1.0, %v1200_v58 }
 0x531   :  { %v1360_v55 = vadd.f32 %v1328_v60, %v1263_v59  ;;  %v1154_v20 = vpop.permute.xlu1 %1153  ;;  %v1083_v34 = vpop.permute.xlu0 %1082  ;;  %v1610_v59 = vld [vmem:[#allocation5 + $0xc0] sm:$0xff] }
 0x532   :  { %1409 = vst [vmem:[#allocation9 + $0xd8] sm:$0xff] %v1377_v63  ;;  %v1347_v9 = vmul.f32 %v1602_v5, %v1315_v10  ;;  %v1330_v12 = vmul.f32 %v1603_v54, %v1298_v61  ;;  %v1219_v41 = vmul.f32 %v2437_v22, %v1154_v20  ;;  %v1202_v38 = vmul.f32 %v2413_v46, %v1083_v34 }
 0x533   :  { %1392 = vst [vmem:[#allocation9 + $0x50] sm:$0xff] %v1360_v55  ;;  %v1284_v29 = vmul.f32 %v2444_v39, %v1154_v20  ;;  %v1267_v27 = vmul.f32 %v2421_v40, %v1083_v34 }
 0x534   :  { %v1379_v56 = vadd.f32 %v1347_v9, %v1282_v35  ;;  %v1362_v17 = vadd.f32 %v1330_v12, %v1265_v33  ;;  %v1317_v30 = vsub.f32 1.0, %v1219_v41  ;;  %v1300_v44 = vsub.f32 1.0, %v1202_v38  ;;  %v1611_v35 = vld [vmem:[#allocation5 + $0xd0] sm:$0xff]  ;;  %v1612_v12 = vld [vmem:[#allocation5 + $0xe0] sm:$0xff] }
 0x535   :  { %v1094_v32 = vpop.permute.xlu0 %1093 }
 0x536   :  { %1411 = vst [vmem:[#allocation9 + $0xe8] sm:$0xff] %v1379_v56  ;;  %1394 = vst [vmem:[#allocation9 + $0x60] sm:$0xff] %v1362_v17  ;;  %v1349_v48 = vmul.f32 %v1604_v6, %v1317_v30  ;;  %v1204_v16 = vmul.f32 %v2437_v22, %v1094_v32  ;;  %v1332_v25 = vmul.f32 %v1605_v28, %v1300_v44  ;;  %v1613_v44 = vld [vmem:[#allocation5 + $0xf0] sm:$0xff] }
 0x537   :  { %v1269_v49 = vmul.f32 %v2444_v39, %v1094_v32 }
 0x538   :  { %v1381_v36 = vadd.f32 %v1349_v48, %v1284_v29  ;;  %v1302_v24 = vsub.f32 1.0, %v1204_v16  ;;  %v1364_v46 = vadd.f32 %v1332_v25, %v1267_v27 }
 0x539   :  { %v1102_v23 = vpop.permute.xlu0 %1101 }
 0x53a   :  { %1413 = vst [vmem:[#allocation9 + $0xf8] sm:$0xff] %v1381_v36  ;;  %v1334_v13 = vmul.f32 %v1606_v37, %v1302_v24  ;;  %v1206_v11 = vmul.f32 %v2437_v22, %v1102_v23  ;;  %1396 = vst [vmem:[#allocation9 + $0x70] sm:$0xff] %v1364_v46  ;;  %v1271_v40 = vmul.f32 %v2444_v39, %v1102_v23 }
 0x53c   :  { %v1366_v7 = vadd.f32 %v1334_v13, %v1269_v49  ;;  %v1304_v19 = vsub.f32 1.0, %v1206_v11 }
 0x53d   :  { %v1110_v43 = vpop.permute.xlu0 %1109 }
 0x53e   :  { %1398 = vst [vmem:[#allocation9 + $0x80] sm:$0xff] %v1366_v7  ;;  %v1336_v62 = vmul.f32 %v1607_v1, %v1304_v19  ;;  %v1208_v26 = vmul.f32 %v2437_v22, %v1110_v43  ;;  %v1273_v50 = vmul.f32 %v2444_v39, %v1110_v43 }
 0x540   :  { %v1368_v2 = vadd.f32 %v1336_v62, %v1271_v40  ;;  %v1306_v0 = vsub.f32 1.0, %v1208_v26 }
 0x541   :  { %v1118_v52 = vpop.permute.xlu0 %1117 }
 0x542   :  { %1400 = vst [vmem:[#allocation9 + $0x90] sm:$0xff] %v1368_v2  ;;  %v1338_v3 = vmul.f32 %v1608_v53, %v1306_v0  ;;  %v1210_v14 = vmul.f32 %v2437_v22, %v1118_v52  ;;  %v1275_v31 = vmul.f32 %v2444_v39, %v1118_v52 }
 0x544   :  { %v1370_v8 = vadd.f32 %v1338_v3, %v1273_v50  ;;  %v1308_v18 = vsub.f32 1.0, %v1210_v14 }
 0x545   :  { %v1126_v15 = vpop.permute.xlu0 %1125 }
 0x546   :  { %1402 = vst [vmem:[#allocation9 + $0xa0] sm:$0xff] %v1370_v8  ;;  %v1340_v47 = vmul.f32 %v1609_v51, %v1308_v18  ;;  %v1212_v45 = vmul.f32 %v2437_v22, %v1126_v15  ;;  %v1277_v58 = vmul.f32 %v2444_v39, %v1126_v15 }
 0x548   :  { %v1372_v4 = vadd.f32 %v1340_v47, %v1275_v31  ;;  %v1310_v42 = vsub.f32 1.0, %v1212_v45 }
 0x549   :  { %v1134_v21 = vpop.permute.xlu0 %1133 }
 0x54a   :  { %1404 = vst [vmem:[#allocation9 + $0xb0] sm:$0xff] %v1372_v4  ;;  %v1342_v57 = vmul.f32 %v1610_v59, %v1310_v42  ;;  %v1214_v60 = vmul.f32 %v2437_v22, %v1134_v21  ;;  %v1279_v55 = vmul.f32 %v2444_v39, %v1134_v21 }
 0x54c   :  { %v1374_v63 = vadd.f32 %v1342_v57, %v1277_v58  ;;  %v1312_v10 = vsub.f32 1.0, %v1214_v60 }
 0x54d   :  { %v1142_v61 = vpop.permute.xlu0 %1141 }
 0x54e   :  { %1406 = vst [vmem:[#allocation9 + $0xc0] sm:$0xff] %v1374_v63  ;;  %v1344_v20 = vmul.f32 %v1611_v35, %v1312_v10  ;;  %v1216_v34 = vmul.f32 %v2437_v22, %v1142_v61  ;;  %v1281_v54 = vmul.f32 %v2444_v39, %v1142_v61 }
 0x550   :  { %v1376_v5 = vadd.f32 %v1344_v20, %v1279_v55  ;;  %v1314_v9 = vsub.f32 1.0, %v1216_v34 }
 0x552   :  { %1408 = vst [vmem:[#allocation9 + $0xd0] sm:$0xff] %v1376_v5  ;;  %v1346_v41 = vmul.f32 %v1612_v12, %v1314_v9 }
 0x554   :  { %v1378_v56 = vadd.f32 %v1346_v41, %v1281_v54 }
 0x555   :  { %v1150_v33 = vpop.permute.xlu0 %1149 }
 0x556   :  { %v1218_v38 = vmul.f32 %v2437_v22, %v1150_v33  ;;  %1410 = vst [vmem:[#allocation9 + $0xe0] sm:$0xff] %v1378_v56  ;;  %v1283_v30 = vmul.f32 %v2444_v39, %v1150_v33 }
 0x558   :  { %v1316_v17 = vsub.f32 1.0, %v1218_v38 }
 0x55a   :  { %v1348_v32 = vmul.f32 %v1613_v44, %v1316_v17 }
 0x55c   :  { %v1380_v29 = vadd.f32 %v1348_v32, %v1283_v30 }
 0x55e   :  { %1412 = vst [vmem:[#allocation9 + $0xf0] sm:$0xff] %v1380_v29 }
 0x55f   :  { %1713 = shalt.err (!%p1710_p8)
}
 0x560   :  { %s1714_s0 = scalar_lea.hbm %s2514_s6, 4096 }
 0x561   :  { %p1715_p9 = scmp.ne.s32.totalorder %s2514_s6, %s1714_s0  ;;  %p1718_p10 = scmp.lt.u32.totalorder %s1714_s0, %s2514_s6 }
 0x563   :  { %p1720_p11 = pnand %p1718_p10, %p1715_p9 }
 0x565   :  { %1723 = shalt.err (!%p1720_p11)
}
 0x566   :  { %1435 = dma.vmem_to_hbm [thread:$0]  %s1430_s28, 4096, %s2514_s6, [#allocation10], %s1733_s7, %s1733_s7, %s1734_s8  }
 0x567   :  { %1728 = dma.done.wait [#allocation4], 32  }
 0x568   :  { %1729 = vsyncadd [#allocation4], 4294967264 }
 0x569   :  { %1730 = dma.done.wait [#allocation10], 4096  }
 0x56a   :  { %1731 = vsyncadd [#allocation10], 4294963200 }
 0x56b   :  { %1442 = vsyncpa [#allocation3], 1 }
 0x56c   :  { %1443 = vsyncpa [#allocation6], 1 }
 0x56d   :  { %1444 = vsyncpa [#allocation4], 1 }
 0x56e   :  { %1445 = vsyncpa [#allocation10], 1 }

</bundles_post_ra>
